<compile_context>
chip_gen: v7x
topology: tpu7x:2x2x1
jax: 0.10.0
libtpu: 0.0.40
codegen_flags: <defaults>
</compile_context>

<pallas_src>
import math
from functools import partial

import jax
import jax.numpy as jnp
from jax import lax
from jax.experimental import pallas as pl
from jax.experimental.pallas import tpu as pltpu


# ----------------------------- Pallas kernel --------------------------------
def conv_pn_lrelu_kernel(x_ref, w_ref, b_ref, o_ref, *, K, Wp, M, neg_slope, eps):
    # x_ref: (Cin, Hp1*Wp)   bf16 — one padded image, spatially flattened (row stride Wp)
    # w_ref: (K*K, Cout, Cin) bf16 — w_ref[kh*K+kw] = eqlr_scale * weight[:, :, kh, kw]
    # b_ref: (Cout, 1)        f32
    # o_ref: (Cout, M)        M = Ho*Wp; the last K-1 columns of each output row are
    #                         over-computed junk, cropped by the caller.
    acc = jnp.zeros(o_ref.shape, jnp.float32)
    for kh in range(K):                      # static unroll: K*K shifted MXU matmuls
        for kw in range(K):
            off = kh * Wp + kw               # static lane offset into the flat image
            slab = x_ref[:, pl.ds(off, M)]   # (Cin, M) bf16
            acc = acc + jnp.dot(w_ref[kh * K + kw], slab,
                                preferred_element_type=jnp.float32)
    acc = acc + b_ref[...]                   # conv bias (broadcast over lanes)
    # PixelNorm over the channel (sublane) axis; rsqrt goes to the EUP slot.
    ms = jnp.mean(acc * acc, axis=0, keepdims=True)
    acc = acc * lax.rsqrt(ms + eps)
    # LeakyReLU(0.2)
    o_ref[...] = jnp.where(acc > 0, acc, neg_slope * acc).astype(o_ref.dtype)


# ------------------------------- JAX glue ------------------------------------
def equal_conv_pn_lrelu(x, weight, bias, K, pad, out_dtype=jnp.float32):
    """EqualConv2d + PixelNorm + LeakyReLU(0.2), fused in one Pallas kernel.

    x: (B, Cin, H, W) channels-first (f32 or bf16).  Returns (B, Cout, Ho, Wo).
    """
    B, Cin, H, W = x.shape
    Cout = weight.shape[0]
    Ho = H + 2 * pad - K + 1
    Wo = W + 2 * pad - K + 1
    Hp1 = H + 2 * pad + 1          # +1 extra bottom row keeps shifted flat slices in-bounds
    Wp = W + 2 * pad
    M = Ho * Wp                    # lane-dense output width (spatial on lanes)
    Lf = Hp1 * Wp

    # EqualLR: weight * sqrt(2 / fan_in), fan_in = Cin * K * K
    fan_in = Cin * K * K
    w_eff = weight * math.sqrt(2.0 / fan_in)
    # (K*K, Cout, Cin), kh-major then kw — matches the in-kernel shift ordering.
    w_k = jnp.transpose(w_eff, (2, 3, 0, 1)).reshape(K * K, Cout, Cin).astype(jnp.bfloat16)
    b2 = bias.reshape(Cout, 1).astype(jnp.float32)

    # Pad once (channels-first, no transposes) and flatten the spatial dims.
    xp = jnp.pad(x.astype(jnp.bfloat16), ((0, 0), (0, 0), (pad, pad + 1), (pad, pad)))
    xf = xp.reshape(B, Cin, Lf)

    kern = partial(conv_pn_lrelu_kernel, K=K, Wp=Wp, M=M, neg_slope=0.2, eps=1e-8)
    out = pl.pallas_call(
        kern,
        out_shape=jax.ShapeDtypeStruct((B, Cout, M), out_dtype),
        grid_spec=pltpu.PrefetchScalarGridSpec(
            num_scalar_prefetch=0,
            grid=(B,),
            in_specs=[
                pl.BlockSpec((None, Cin, Lf), lambda b: (b, 0, 0)),       # one image / step
                pl.BlockSpec((K * K, Cout, Cin), lambda b: (0, 0, 0)),    # resident weights
                pl.BlockSpec((Cout, 1), lambda b: (0, 0)),                # resident bias
            ],
            out_specs=pl.BlockSpec((None, Cout, M), lambda b: (b, 0, 0)),
        ),
        compiler_params=pltpu.CompilerParams(
            dimension_semantics=("parallel",),
            vmem_limit_bytes=48 * 1024 * 1024,
        ),
    )(xf, w_k, b2)

    # (B, Cout, Ho, Wp) wide rows -> crop the K-1 over-computed junk columns.
    return out.reshape(B, Cout, Ho, Wp)[:, :, :, :Wo]


def conv_block(x, w1, b1, w2, b2, K, pad):
    """ConvBlock forward (EQLR + PixelNorm path), channels-first in/out."""
    # Intermediate activation stays channels-first and bf16 (no layout round trips).
    h = equal_conv_pn_lrelu(x, w1, b1, K, pad, out_dtype=jnp.bfloat16)
    return equal_conv_pn_lrelu(h, w2, b2, K, pad, out_dtype=jnp.float32)


# --------------------------- pure-JAX references ------------------------------
def _ref_layer(x, w, b, K, pad, quantize):
    fan_in = w.shape[1] * K * K
    w_eff = w * math.sqrt(2.0 / fan_in)
    if quantize:  # mirror the kernel's bf16 MXU operands (f32 accumulation)
        x = x.astype(jnp.bfloat16).astype(jnp.float32)
        w_eff = w_eff.astype(jnp.bfloat16).astype(jnp.float32)
    y = lax.conv_general_dilated(
        x, w_eff, (1, 1), [(pad, pad), (pad, pad)],
        dimension_numbers=("NCHW", "OIHW", "NCHW"))
    y = y + b[None, :, None, None]
    y = y / jnp.sqrt(jnp.mean(y ** 2, axis=1, keepdims=True) + 1e-8)
    return jnp.where(y > 0, y, 0.2 * y)


def conv_block_ref(x, w1, b1, w2, b2, K, pad, quantize=False):
    h = _ref_layer(x, w1, b1, K, pad, quantize)
    if quantize:  # kernel stores the intermediate activation in bf16
        h = h.astype(jnp.bfloat16).astype(jnp.float32)
    return _ref_layer(h, w2, b2, K, pad, quantize)


# --------------------------------- main ---------------------------------------
if __name__ == "__main__":
    key = jax.random.PRNGKey(0)
    B, Cin, H, W = 2, 4, 16, 16
    Cout = 8
    K, pad = 3, 1

    k1, k2, k3 = jax.random.split(key, 3)
    # EqualConv2d init: weight ~ N(0,1), bias = 0
    w1 = jax.random.normal(k1, (Cout, Cin, K, K), jnp.float32)
    b1 = jnp.zeros((Cout,), jnp.float32)
    w2 = jax.random.normal(k2, (Cout, Cout, K, K), jnp.float32)
    b2 = jnp.zeros((Cout,), jnp.float32)
    x = jax.random.normal(k3, (B, Cin, H, W), jnp.float32)

    fwd = jax.jit(conv_block, static_argnames=("K", "pad"))
    out = jax.block_until_ready(fwd(x, w1, b1, w2, b2, K=K, pad=pad))
    assert out.shape == (B, Cout, H, W)

    # Tight check vs. a bf16-operand-matched reference (validates kernel math/indexing).
    ref_match = jax.block_until_ready(
        conv_block_ref(x, w1, b1, w2, b2, K, pad, quantize=True))
    assert jnp.allclose(out, ref_match, atol=1e-2, rtol=1e-2), \
        "mismatch vs bf16-matched JAX reference"

    # Loose check vs. the full-f32 PyTorch-semantics reference (bf16 quantization only).
    ref_f32 = jax.block_until_ready(
        conv_block_ref(x, w1, b1, w2, b2, K, pad, quantize=False))
    assert jnp.allclose(out, ref_f32, atol=1e-1, rtol=1e-1), \
        "mismatch vs f32 JAX reference"

    print("KERNEL_OK")
</pallas_src>

<mosaic_0001>
module attributes {stable_mosaic.version = 11 : i64} {
  func.func @conv_pn_lrelu_kernel(%arg0: i32, %arg1: memref<1x4x342xbf16, #tpu.memory_space<vmem>>, %arg2: memref<9x8x4xbf16, #tpu.memory_space<vmem>>, %arg3: memref<8x1xf32, #tpu.memory_space<vmem>>, %arg4: memref<1x8x288xbf16, #tpu.memory_space<vmem>>) attributes {dimension_semantics = [#tpu.dimension_semantics<parallel>], iteration_bounds = array<i64: 2>, scalar_prefetch = 0 : i64, scratch_operands = 0 : i64, tpu.core_type = #tpu.core_type<tc>, window_params = [{transform_indices = @transform_0, window_bounds = array<i64: 1, 4, 342>}, {pipeline_mode = #tpu.pipeline_mode<synchronous>, transform_indices = @transform_1, window_bounds = array<i64: 9, 8, 4>}, {pipeline_mode = #tpu.pipeline_mode<synchronous>, transform_indices = @transform_2, window_bounds = array<i64: 8, 1>}, {transform_indices = @transform_3, window_bounds = array<i64: 1, 8, 288>}]} {
    %cst = arith.constant 0.000000e+00 : f32
    %0 = vector.broadcast %cst : f32 to vector<8x288xf32>
    %c0 = arith.constant 0 : index
    %c0_0 = arith.constant 0 : index
    %c0_1 = arith.constant 0 : index
    %1 = vector.load %arg1[%c0, %c0_0, %c0_1] : memref<1x4x342xbf16, #tpu.memory_space<vmem>>, vector<1x4x288xbf16>
    %2 = vector.shape_cast %1 : vector<1x4x288xbf16> to vector<4x288xbf16>
    %c0_2 = arith.constant 0 : index
    %c0_3 = arith.constant 0 : index
    %c0_4 = arith.constant 0 : index
    %3 = vector.load %arg2[%c0_2, %c0_3, %c0_4] : memref<9x8x4xbf16, #tpu.memory_space<vmem>>, vector<1x8x4xbf16>
    %4 = vector.shape_cast %3 : vector<1x8x4xbf16> to vector<8x4xbf16>
    %cst_5 = arith.constant dense<0.000000e+00> : vector<8x288xf32>
    %5 = tpu.matmul %4, %2, %cst_5 {dimension_numbers = #tpu.dot_dimension_numbers<[1], [0], [0], [1], [0, 0, 1, 1], [], []>} : vector<8x4xbf16>, vector<4x288xbf16>, vector<8x288xf32> -> vector<8x288xf32>
    %6 = arith.addf %0, %5 : vector<8x288xf32>
    %c0_6 = arith.constant 0 : index
    %c0_7 = arith.constant 0 : index
    %c1 = arith.constant 1 : index
    %7 = vector.load %arg1[%c0_6, %c0_7, %c1] : memref<1x4x342xbf16, #tpu.memory_space<vmem>>, vector<1x4x288xbf16>
    %8 = vector.shape_cast %7 : vector<1x4x288xbf16> to vector<4x288xbf16>
    %c1_8 = arith.constant 1 : index
    %c0_9 = arith.constant 0 : index
    %c0_10 = arith.constant 0 : index
    %9 = vector.load %arg2[%c1_8, %c0_9, %c0_10] : memref<9x8x4xbf16, #tpu.memory_space<vmem>>, vector<1x8x4xbf16>
    %10 = vector.shape_cast %9 : vector<1x8x4xbf16> to vector<8x4xbf16>
    %cst_11 = arith.constant dense<0.000000e+00> : vector<8x288xf32>
    %11 = tpu.matmul %10, %8, %cst_11 {dimension_numbers = #tpu.dot_dimension_numbers<[1], [0], [0], [1], [0, 0, 1, 1], [], []>} : vector<8x4xbf16>, vector<4x288xbf16>, vector<8x288xf32> -> vector<8x288xf32>
    %12 = arith.addf %6, %11 : vector<8x288xf32>
    %c0_12 = arith.constant 0 : index
    %c0_13 = arith.constant 0 : index
    %c2 = arith.constant 2 : index
    %13 = vector.load %arg1[%c0_12, %c0_13, %c2] : memref<1x4x342xbf16, #tpu.memory_space<vmem>>, vector<1x4x288xbf16>
    %14 = vector.shape_cast %13 : vector<1x4x288xbf16> to vector<4x288xbf16>
    %c2_14 = arith.constant 2 : index
    %c0_15 = arith.constant 0 : index
    %c0_16 = arith.constant 0 : index
    %15 = vector.load %arg2[%c2_14, %c0_15, %c0_16] : memref<9x8x4xbf16, #tpu.memory_space<vmem>>, vector<1x8x4xbf16>
    %16 = vector.shape_cast %15 : vector<1x8x4xbf16> to vector<8x4xbf16>
    %cst_17 = arith.constant dense<0.000000e+00> : vector<8x288xf32>
    %17 = tpu.matmul %16, %14, %cst_17 {dimension_numbers = #tpu.dot_dimension_numbers<[1], [0], [0], [1], [0, 0, 1, 1], [], []>} : vector<8x4xbf16>, vector<4x288xbf16>, vector<8x288xf32> -> vector<8x288xf32>
    %18 = arith.addf %12, %17 : vector<8x288xf32>
    %c0_18 = arith.constant 0 : index
    %c0_19 = arith.constant 0 : index
    %c18 = arith.constant 18 : index
    %19 = vector.load %arg1[%c0_18, %c0_19, %c18] : memref<1x4x342xbf16, #tpu.memory_space<vmem>>, vector<1x4x288xbf16>
    %20 = vector.shape_cast %19 : vector<1x4x288xbf16> to vector<4x288xbf16>
    %c3 = arith.constant 3 : index
    %c0_20 = arith.constant 0 : index
    %c0_21 = arith.constant 0 : index
    %21 = vector.load %arg2[%c3, %c0_20, %c0_21] : memref<9x8x4xbf16, #tpu.memory_space<vmem>>, vector<1x8x4xbf16>
    %22 = vector.shape_cast %21 : vector<1x8x4xbf16> to vector<8x4xbf16>
    %cst_22 = arith.constant dense<0.000000e+00> : vector<8x288xf32>
    %23 = tpu.matmul %22, %20, %cst_22 {dimension_numbers = #tpu.dot_dimension_numbers<[1], [0], [0], [1], [0, 0, 1, 1], [], []>} : vector<8x4xbf16>, vector<4x288xbf16>, vector<8x288xf32> -> vector<8x288xf32>
    %24 = arith.addf %18, %23 : vector<8x288xf32>
    %c0_23 = arith.constant 0 : index
    %c0_24 = arith.constant 0 : index
    %c19 = arith.constant 19 : index
    %25 = vector.load %arg1[%c0_23, %c0_24, %c19] : memref<1x4x342xbf16, #tpu.memory_space<vmem>>, vector<1x4x288xbf16>
    %26 = vector.shape_cast %25 : vector<1x4x288xbf16> to vector<4x288xbf16>
    %c4 = arith.constant 4 : index
    %c0_25 = arith.constant 0 : index
    %c0_26 = arith.constant 0 : index
    %27 = vector.load %arg2[%c4, %c0_25, %c0_26] : memref<9x8x4xbf16, #tpu.memory_space<vmem>>, vector<1x8x4xbf16>
    %28 = vector.shape_cast %27 : vector<1x8x4xbf16> to vector<8x4xbf16>
    %cst_27 = arith.constant dense<0.000000e+00> : vector<8x288xf32>
    %29 = tpu.matmul %28, %26, %cst_27 {dimension_numbers = #tpu.dot_dimension_numbers<[1], [0], [0], [1], [0, 0, 1, 1], [], []>} : vector<8x4xbf16>, vector<4x288xbf16>, vector<8x288xf32> -> vector<8x288xf32>
    %30 = arith.addf %24, %29 : vector<8x288xf32>
    %c0_28 = arith.constant 0 : index
    %c0_29 = arith.constant 0 : index
    %c20 = arith.constant 20 : index
    %31 = vector.load %arg1[%c0_28, %c0_29, %c20] : memref<1x4x342xbf16, #tpu.memory_space<vmem>>, vector<1x4x288xbf16>
    %32 = vector.shape_cast %31 : vector<1x4x288xbf16> to vector<4x288xbf16>
    %c5 = arith.constant 5 : index
    %c0_30 = arith.constant 0 : index
    %c0_31 = arith.constant 0 : index
    %33 = vector.load %arg2[%c5, %c0_30, %c0_31] : memref<9x8x4xbf16, #tpu.memory_space<vmem>>, vector<1x8x4xbf16>
    %34 = vector.shape_cast %33 : vector<1x8x4xbf16> to vector<8x4xbf16>
    %cst_32 = arith.constant dense<0.000000e+00> : vector<8x288xf32>
    %35 = tpu.matmul %34, %32, %cst_32 {dimension_numbers = #tpu.dot_dimension_numbers<[1], [0], [0], [1], [0, 0, 1, 1], [], []>} : vector<8x4xbf16>, vector<4x288xbf16>, vector<8x288xf32> -> vector<8x288xf32>
    %36 = arith.addf %30, %35 : vector<8x288xf32>
    %c0_33 = arith.constant 0 : index
    %c0_34 = arith.constant 0 : index
    %c36 = arith.constant 36 : index
    %37 = vector.load %arg1[%c0_33, %c0_34, %c36] : memref<1x4x342xbf16, #tpu.memory_space<vmem>>, vector<1x4x288xbf16>
    %38 = vector.shape_cast %37 : vector<1x4x288xbf16> to vector<4x288xbf16>
    %c6 = arith.constant 6 : index
    %c0_35 = arith.constant 0 : index
    %c0_36 = arith.constant 0 : index
    %39 = vector.load %arg2[%c6, %c0_35, %c0_36] : memref<9x8x4xbf16, #tpu.memory_space<vmem>>, vector<1x8x4xbf16>
    %40 = vector.shape_cast %39 : vector<1x8x4xbf16> to vector<8x4xbf16>
    %cst_37 = arith.constant dense<0.000000e+00> : vector<8x288xf32>
    %41 = tpu.matmul %40, %38, %cst_37 {dimension_numbers = #tpu.dot_dimension_numbers<[1], [0], [0], [1], [0, 0, 1, 1], [], []>} : vector<8x4xbf16>, vector<4x288xbf16>, vector<8x288xf32> -> vector<8x288xf32>
    %42 = arith.addf %36, %41 : vector<8x288xf32>
    %c0_38 = arith.constant 0 : index
    %c0_39 = arith.constant 0 : index
    %c37 = arith.constant 37 : index
    %43 = vector.load %arg1[%c0_38, %c0_39, %c37] : memref<1x4x342xbf16, #tpu.memory_space<vmem>>, vector<1x4x288xbf16>
    %44 = vector.shape_cast %43 : vector<1x4x288xbf16> to vector<4x288xbf16>
    %c7 = arith.constant 7 : index
    %c0_40 = arith.constant 0 : index
    %c0_41 = arith.constant 0 : index
    %45 = vector.load %arg2[%c7, %c0_40, %c0_41] : memref<9x8x4xbf16, #tpu.memory_space<vmem>>, vector<1x8x4xbf16>
    %46 = vector.shape_cast %45 : vector<1x8x4xbf16> to vector<8x4xbf16>
    %cst_42 = arith.constant dense<0.000000e+00> : vector<8x288xf32>
    %47 = tpu.matmul %46, %44, %cst_42 {dimension_numbers = #tpu.dot_dimension_numbers<[1], [0], [0], [1], [0, 0, 1, 1], [], []>} : vector<8x4xbf16>, vector<4x288xbf16>, vector<8x288xf32> -> vector<8x288xf32>
    %48 = arith.addf %42, %47 : vector<8x288xf32>
    %c0_43 = arith.constant 0 : index
    %c0_44 = arith.constant 0 : index
    %c38 = arith.constant 38 : index
    %49 = vector.load %arg1[%c0_43, %c0_44, %c38] : memref<1x4x342xbf16, #tpu.memory_space<vmem>>, vector<1x4x288xbf16>
    %50 = vector.shape_cast %49 : vector<1x4x288xbf16> to vector<4x288xbf16>
    %c8 = arith.constant 8 : index
    %c0_45 = arith.constant 0 : index
    %c0_46 = arith.constant 0 : index
    %51 = vector.load %arg2[%c8, %c0_45, %c0_46] : memref<9x8x4xbf16, #tpu.memory_space<vmem>>, vector<1x8x4xbf16>
    %52 = vector.shape_cast %51 : vector<1x8x4xbf16> to vector<8x4xbf16>
    %cst_47 = arith.constant dense<0.000000e+00> : vector<8x288xf32>
    %53 = tpu.matmul %52, %50, %cst_47 {dimension_numbers = #tpu.dot_dimension_numbers<[1], [0], [0], [1], [0, 0, 1, 1], [], []>} : vector<8x4xbf16>, vector<4x288xbf16>, vector<8x288xf32> -> vector<8x288xf32>
    %54 = arith.addf %48, %53 : vector<8x288xf32>
    %c0_48 = arith.constant 0 : index
    %c0_49 = arith.constant 0 : index
    %55 = vector.load %arg3[%c0_48, %c0_49] : memref<8x1xf32, #tpu.memory_space<vmem>>, vector<8x1xf32>
    %56 = vector.broadcast %55 : vector<8x1xf32> to vector<8x288xf32>
    %57 = arith.addf %54, %56 : vector<8x288xf32>
    %58 = arith.mulf %57, %57 : vector<8x288xf32>
    %cst_50 = arith.constant dense<0.000000e+00> : vector<288xf32>
    %59 = vector.multi_reduction <add>, %58, %cst_50 [0] : vector<8x288xf32> to vector<288xf32>
    %60 = vector.shape_cast %59 : vector<288xf32> to vector<1x288xf32>
    %cst_51 = arith.constant 8.000000e+00 : f32
    %61 = vector.broadcast %cst_51 : f32 to vector<1x288xf32>
    %62 = arith.divf %60, %61 : vector<1x288xf32>
    %cst_52 = arith.constant 9.99999993E-9 : f32
    %63 = vector.broadcast %cst_52 : f32 to vector<1x288xf32>
    %64 = arith.addf %62, %63 : vector<1x288xf32>
    %65 = math.rsqrt %64 : vector<1x288xf32>
    %66 = vector.broadcast %65 : vector<1x288xf32> to vector<8x288xf32>
    %67 = arith.mulf %57, %66 : vector<8x288xf32>
    %cst_53 = arith.constant 0.000000e+00 : f32
    %68 = vector.broadcast %cst_53 : f32 to vector<8x288xf32>
    %69 = arith.cmpf ogt, %67, %68 : vector<8x288xf32>
    %cst_54 = arith.constant 2.000000e-01 : f32
    %70 = vector.broadcast %cst_54 : f32 to vector<8x288xf32>
    %71 = arith.mulf %70, %67 : vector<8x288xf32>
    %72 = arith.select %69, %67, %71 : vector<8x288xi1>, vector<8x288xf32>
    %73 = arith.truncf %72 : vector<8x288xf32> to vector<8x288xbf16>
    %c0_55 = arith.constant 0 : index
    %c0_56 = arith.constant 0 : index
    %c0_57 = arith.constant 0 : index
    %74 = vector.load %arg4[%c0_55, %c0_56, %c0_57] : memref<1x8x288xbf16, #tpu.memory_space<vmem>>, vector<1x8x288xbf16>
    %75 = vector.shape_cast %74 : vector<1x8x288xbf16> to vector<8x288xbf16>
    %76 = vector.shape_cast %73 : vector<8x288xbf16> to vector<1x8x288xbf16>
    tpu.vector_store %arg4[%c0_55, %c0_56, %c0_57], %76 {strides = array<i32>} : memref<1x8x288xbf16, #tpu.memory_space<vmem>>, vector<1x8x288xbf16>,
    return
  }
  func.func @transform_0(%arg0: i32) -> (i32, i32, i32) {
    %c0_i32 = arith.constant 0 : i32
    %c0_i32_0 = arith.constant 0 : i32
    %c0_i32_1 = arith.constant 0 : i32
    return %arg0, %c0_i32, %c0_i32_0 : i32, i32, i32
  }
  func.func @transform_1(%arg0: i32) -> (i32, i32, i32) {
    %c0_i32 = arith.constant 0 : i32
    %c0_i32_0 = arith.constant 0 : i32
    %c0_i32_1 = arith.constant 0 : i32
    %c0_i32_2 = arith.constant 0 : i32
    return %c0_i32, %c0_i32_0, %c0_i32_1 : i32, i32, i32
  }
  func.func @transform_2(%arg0: i32) -> (i32, i32) {
    %c0_i32 = arith.constant 0 : i32
    %c0_i32_0 = arith.constant 0 : i32
    %c0_i32_1 = arith.constant 0 : i32
    return %c0_i32, %c0_i32_0 : i32, i32
  }
  func.func @transform_3(%arg0: i32) -> (i32, i32, i32) {
    %c0_i32 = arith.constant 0 : i32
    %c0_i32_0 = arith.constant 0 : i32
    %c0_i32_1 = arith.constant 0 : i32
    return %arg0, %c0_i32, %c0_i32_0 : i32, i32, i32
  }
}

module attributes {stable_mosaic.version = 11 : i64} {
  func.func @conv_pn_lrelu_kernel(%arg0: i32, %arg1: memref<1x8x342xbf16, #tpu.memory_space<vmem>>, %arg2: memref<9x8x8xbf16, #tpu.memory_space<vmem>>, %arg3: memref<8x1xf32, #tpu.memory_space<vmem>>, %arg4: memref<1x8x288xf32, #tpu.memory_space<vmem>>) attributes {dimension_semantics = [#tpu.dimension_semantics<parallel>], iteration_bounds = array<i64: 2>, scalar_prefetch = 0 : i64, scratch_operands = 0 : i64, tpu.core_type = #tpu.core_type<tc>, window_params = [{transform_indices = @transform_0, window_bounds = array<i64: 1, 8, 342>}, {pipeline_mode = #tpu.pipeline_mode<synchronous>, transform_indices = @transform_1, window_bounds = array<i64: 9, 8, 8>}, {pipeline_mode = #tpu.pipeline_mode<synchronous>, transform_indices = @transform_2, window_bounds = array<i64: 8, 1>}, {transform_indices = @transform_3, window_bounds = array<i64: 1, 8, 288>}]} {
    %cst = arith.constant 0.000000e+00 : f32
    %0 = vector.broadcast %cst : f32 to vector<8x288xf32>
    %c0 = arith.constant 0 : index
    %c0_0 = arith.constant 0 : index
    %c0_1 = arith.constant 0 : index
    %1 = vector.load %arg1[%c0, %c0_0, %c0_1] : memref<1x8x342xbf16, #tpu.memory_space<vmem>>, vector<1x8x288xbf16>
    %2 = vector.shape_cast %1 : vector<1x8x288xbf16> to vector<8x288xbf16>
    %c0_2 = arith.constant 0 : index
    %c0_3 = arith.constant 0 : index
    %c0_4 = arith.constant 0 : index
    %3 = vector.load %arg2[%c0_2, %c0_3, %c0_4] : memref<9x8x8xbf16, #tpu.memory_space<vmem>>, vector<1x8x8xbf16>
    %4 = vector.shape_cast %3 : vector<1x8x8xbf16> to vector<8x8xbf16>
    %cst_5 = arith.constant dense<0.000000e+00> : vector<8x288xf32>
    %5 = tpu.matmul %4, %2, %cst_5 {dimension_numbers = #tpu.dot_dimension_numbers<[1], [0], [0], [1], [0, 0, 1, 1], [], []>} : vector<8x8xbf16>, vector<8x288xbf16>, vector<8x288xf32> -> vector<8x288xf32>
    %6 = arith.addf %0, %5 : vector<8x288xf32>
    %c0_6 = arith.constant 0 : index
    %c0_7 = arith.constant 0 : index
    %c1 = arith.constant 1 : index
    %7 = vector.load %arg1[%c0_6, %c0_7, %c1] : memref<1x8x342xbf16, #tpu.memory_space<vmem>>, vector<1x8x288xbf16>
    %8 = vector.shape_cast %7 : vector<1x8x288xbf16> to vector<8x288xbf16>
    %c1_8 = arith.constant 1 : index
    %c0_9 = arith.constant 0 : index
    %c0_10 = arith.constant 0 : index
    %9 = vector.load %arg2[%c1_8, %c0_9, %c0_10] : memref<9x8x8xbf16, #tpu.memory_space<vmem>>, vector<1x8x8xbf16>
    %10 = vector.shape_cast %9 : vector<1x8x8xbf16> to vector<8x8xbf16>
    %cst_11 = arith.constant dense<0.000000e+00> : vector<8x288xf32>
    %11 = tpu.matmul %10, %8, %cst_11 {dimension_numbers = #tpu.dot_dimension_numbers<[1], [0], [0], [1], [0, 0, 1, 1], [], []>} : vector<8x8xbf16>, vector<8x288xbf16>, vector<8x288xf32> -> vector<8x288xf32>
    %12 = arith.addf %6, %11 : vector<8x288xf32>
    %c0_12 = arith.constant 0 : index
    %c0_13 = arith.constant 0 : index
    %c2 = arith.constant 2 : index
    %13 = vector.load %arg1[%c0_12, %c0_13, %c2] : memref<1x8x342xbf16, #tpu.memory_space<vmem>>, vector<1x8x288xbf16>
    %14 = vector.shape_cast %13 : vector<1x8x288xbf16> to vector<8x288xbf16>
    %c2_14 = arith.constant 2 : index
    %c0_15 = arith.constant 0 : index
    %c0_16 = arith.constant 0 : index
    %15 = vector.load %arg2[%c2_14, %c0_15, %c0_16] : memref<9x8x8xbf16, #tpu.memory_space<vmem>>, vector<1x8x8xbf16>
    %16 = vector.shape_cast %15 : vector<1x8x8xbf16> to vector<8x8xbf16>
    %cst_17 = arith.constant dense<0.000000e+00> : vector<8x288xf32>
    %17 = tpu.matmul %16, %14, %cst_17 {dimension_numbers = #tpu.dot_dimension_numbers<[1], [0], [0], [1], [0, 0, 1, 1], [], []>} : vector<8x8xbf16>, vector<8x288xbf16>, vector<8x288xf32> -> vector<8x288xf32>
    %18 = arith.addf %12, %17 : vector<8x288xf32>
    %c0_18 = arith.constant 0 : index
    %c0_19 = arith.constant 0 : index
    %c18 = arith.constant 18 : index
    %19 = vector.load %arg1[%c0_18, %c0_19, %c18] : memref<1x8x342xbf16, #tpu.memory_space<vmem>>, vector<1x8x288xbf16>
    %20 = vector.shape_cast %19 : vector<1x8x288xbf16> to vector<8x288xbf16>
    %c3 = arith.constant 3 : index
    %c0_20 = arith.constant 0 : index
    %c0_21 = arith.constant 0 : index
    %21 = vector.load %arg2[%c3, %c0_20, %c0_21] : memref<9x8x8xbf16, #tpu.memory_space<vmem>>, vector<1x8x8xbf16>
    %22 = vector.shape_cast %21 : vector<1x8x8xbf16> to vector<8x8xbf16>
    %cst_22 = arith.constant dense<0.000000e+00> : vector<8x288xf32>
    %23 = tpu.matmul %22, %20, %cst_22 {dimension_numbers = #tpu.dot_dimension_numbers<[1], [0], [0], [1], [0, 0, 1, 1], [], []>} : vector<8x8xbf16>, vector<8x288xbf16>, vector<8x288xf32> -> vector<8x288xf32>
    %24 = arith.addf %18, %23 : vector<8x288xf32>
    %c0_23 = arith.constant 0 : index
    %c0_24 = arith.constant 0 : index
    %c19 = arith.constant 19 : index
    %25 = vector.load %arg1[%c0_23, %c0_24, %c19] : memref<1x8x342xbf16, #tpu.memory_space<vmem>>, vector<1x8x288xbf16>
    %26 = vector.shape_cast %25 : vector<1x8x288xbf16> to vector<8x288xbf16>
    %c4 = arith.constant 4 : index
    %c0_25 = arith.constant 0 : index
    %c0_26 = arith.constant 0 : index
    %27 = vector.load %arg2[%c4, %c0_25, %c0_26] : memref<9x8x8xbf16, #tpu.memory_space<vmem>>, vector<1x8x8xbf16>
    %28 = vector.shape_cast %27 : vector<1x8x8xbf16> to vector<8x8xbf16>
    %cst_27 = arith.constant dense<0.000000e+00> : vector<8x288xf32>
    %29 = tpu.matmul %28, %26, %cst_27 {dimension_numbers = #tpu.dot_dimension_numbers<[1], [0], [0], [1], [0, 0, 1, 1], [], []>} : vector<8x8xbf16>, vector<8x288xbf16>, vector<8x288xf32> -> vector<8x288xf32>
    %30 = arith.addf %24, %29 : vector<8x288xf32>
    %c0_28 = arith.constant 0 : index
    %c0_29 = arith.constant 0 : index
    %c20 = arith.constant 20 : index
    %31 = vector.load %arg1[%c0_28, %c0_29, %c20] : memref<1x8x342xbf16, #tpu.memory_space<vmem>>, vector<1x8x288xbf16>
    %32 = vector.shape_cast %31 : vector<1x8x288xbf16> to vector<8x288xbf16>
    %c5 = arith.constant 5 : index
    %c0_30 = arith.constant 0 : index
    %c0_31 = arith.constant 0 : index
    %33 = vector.load %arg2[%c5, %c0_30, %c0_31] : memref<9x8x8xbf16, #tpu.memory_space<vmem>>, vector<1x8x8xbf16>
    %34 = vector.shape_cast %33 : vector<1x8x8xbf16> to vector<8x8xbf16>
    %cst_32 = arith.constant dense<0.000000e+00> : vector<8x288xf32>
    %35 = tpu.matmul %34, %32, %cst_32 {dimension_numbers = #tpu.dot_dimension_numbers<[1], [0], [0], [1], [0, 0, 1, 1], [], []>} : vector<8x8xbf16>, vector<8x288xbf16>, vector<8x288xf32> -> vector<8x288xf32>
    %36 = arith.addf %30, %35 : vector<8x288xf32>
    %c0_33 = arith.constant 0 : index
    %c0_34 = arith.constant 0 : index
    %c36 = arith.constant 36 : index
    %37 = vector.load %arg1[%c0_33, %c0_34, %c36] : memref<1x8x342xbf16, #tpu.memory_space<vmem>>, vector<1x8x288xbf16>
    %38 = vector.shape_cast %37 : vector<1x8x288xbf16> to vector<8x288xbf16>
    %c6 = arith.constant 6 : index
    %c0_35 = arith.constant 0 : index
    %c0_36 = arith.constant 0 : index
    %39 = vector.load %arg2[%c6, %c0_35, %c0_36] : memref<9x8x8xbf16, #tpu.memory_space<vmem>>, vector<1x8x8xbf16>
    %40 = vector.shape_cast %39 : vector<1x8x8xbf16> to vector<8x8xbf16>
    %cst_37 = arith.constant dense<0.000000e+00> : vector<8x288xf32>
    %41 = tpu.matmul %40, %38, %cst_37 {dimension_numbers = #tpu.dot_dimension_numbers<[1], [0], [0], [1], [0, 0, 1, 1], [], []>} : vector<8x8xbf16>, vector<8x288xbf16>, vector<8x288xf32> -> vector<8x288xf32>
    %42 = arith.addf %36, %41 : vector<8x288xf32>
    %c0_38 = arith.constant 0 : index
    %c0_39 = arith.constant 0 : index
    %c37 = arith.constant 37 : index
    %43 = vector.load %arg1[%c0_38, %c0_39, %c37] : memref<1x8x342xbf16, #tpu.memory_space<vmem>>, vector<1x8x288xbf16>
    %44 = vector.shape_cast %43 : vector<1x8x288xbf16> to vector<8x288xbf16>
    %c7 = arith.constant 7 : index
    %c0_40 = arith.constant 0 : index
    %c0_41 = arith.constant 0 : index
    %45 = vector.load %arg2[%c7, %c0_40, %c0_41] : memref<9x8x8xbf16, #tpu.memory_space<vmem>>, vector<1x8x8xbf16>
    %46 = vector.shape_cast %45 : vector<1x8x8xbf16> to vector<8x8xbf16>
    %cst_42 = arith.constant dense<0.000000e+00> : vector<8x288xf32>
    %47 = tpu.matmul %46, %44, %cst_42 {dimension_numbers = #tpu.dot_dimension_numbers<[1], [0], [0], [1], [0, 0, 1, 1], [], []>} : vector<8x8xbf16>, vector<8x288xbf16>, vector<8x288xf32> -> vector<8x288xf32>
    %48 = arith.addf %42, %47 : vector<8x288xf32>
    %c0_43 = arith.constant 0 : index
    %c0_44 = arith.constant 0 : index
    %c38 = arith.constant 38 : index
    %49 = vector.load %arg1[%c0_43, %c0_44, %c38] : memref<1x8x342xbf16, #tpu.memory_space<vmem>>, vector<1x8x288xbf16>
    %50 = vector.shape_cast %49 : vector<1x8x288xbf16> to vector<8x288xbf16>
    %c8 = arith.constant 8 : index
    %c0_45 = arith.constant 0 : index
    %c0_46 = arith.constant 0 : index
    %51 = vector.load %arg2[%c8, %c0_45, %c0_46] : memref<9x8x8xbf16, #tpu.memory_space<vmem>>, vector<1x8x8xbf16>
    %52 = vector.shape_cast %51 : vector<1x8x8xbf16> to vector<8x8xbf16>
    %cst_47 = arith.constant dense<0.000000e+00> : vector<8x288xf32>
    %53 = tpu.matmul %52, %50, %cst_47 {dimension_numbers = #tpu.dot_dimension_numbers<[1], [0], [0], [1], [0, 0, 1, 1], [], []>} : vector<8x8xbf16>, vector<8x288xbf16>, vector<8x288xf32> -> vector<8x288xf32>
    %54 = arith.addf %48, %53 : vector<8x288xf32>
    %c0_48 = arith.constant 0 : index
    %c0_49 = arith.constant 0 : index
    %55 = vector.load %arg3[%c0_48, %c0_49] : memref<8x1xf32, #tpu.memory_space<vmem>>, vector<8x1xf32>
    %56 = vector.broadcast %55 : vector<8x1xf32> to vector<8x288xf32>
    %57 = arith.addf %54, %56 : vector<8x288xf32>
    %58 = arith.mulf %57, %57 : vector<8x288xf32>
    %cst_50 = arith.constant dense<0.000000e+00> : vector<288xf32>
    %59 = vector.multi_reduction <add>, %58, %cst_50 [0] : vector<8x288xf32> to vector<288xf32>
    %60 = vector.shape_cast %59 : vector<288xf32> to vector<1x288xf32>
    %cst_51 = arith.constant 8.000000e+00 : f32
    %61 = vector.broadcast %cst_51 : f32 to vector<1x288xf32>
    %62 = arith.divf %60, %61 : vector<1x288xf32>
    %cst_52 = arith.constant 9.99999993E-9 : f32
    %63 = vector.broadcast %cst_52 : f32 to vector<1x288xf32>
    %64 = arith.addf %62, %63 : vector<1x288xf32>
    %65 = math.rsqrt %64 : vector<1x288xf32>
    %66 = vector.broadcast %65 : vector<1x288xf32> to vector<8x288xf32>
    %67 = arith.mulf %57, %66 : vector<8x288xf32>
    %cst_53 = arith.constant 0.000000e+00 : f32
    %68 = vector.broadcast %cst_53 : f32 to vector<8x288xf32>
    %69 = arith.cmpf ogt, %67, %68 : vector<8x288xf32>
    %cst_54 = arith.constant 2.000000e-01 : f32
    %70 = vector.broadcast %cst_54 : f32 to vector<8x288xf32>
    %71 = arith.mulf %70, %67 : vector<8x288xf32>
    %72 = arith.select %69, %67, %71 : vector<8x288xi1>, vector<8x288xf32>
    %c0_55 = arith.constant 0 : index
    %c0_56 = arith.constant 0 : index
    %c0_57 = arith.constant 0 : index
    %73 = vector.load %arg4[%c0_55, %c0_56, %c0_57] : memref<1x8x288xf32, #tpu.memory_space<vmem>>, vector<1x8x288xf32>
    %74 = vector.shape_cast %73 : vector<1x8x288xf32> to vector<8x288xf32>
    %75 = vector.shape_cast %72 : vector<8x288xf32> to vector<1x8x288xf32>
    tpu.vector_store %arg4[%c0_55, %c0_56, %c0_57], %75 {strides = array<i32>} : memref<1x8x288xf32, #tpu.memory_space<vmem>>, vector<1x8x288xf32>,
    return
  }
  func.func @transform_0(%arg0: i32) -> (i32, i32, i32) {
    %c0_i32 = arith.constant 0 : i32
    %c0_i32_0 = arith.constant 0 : i32
    %c0_i32_1 = arith.constant 0 : i32
    return %arg0, %c0_i32, %c0_i32_0 : i32, i32, i32
  }
  func.func @transform_1(%arg0: i32) -> (i32, i32, i32) {
    %c0_i32 = arith.constant 0 : i32
    %c0_i32_0 = arith.constant 0 : i32
    %c0_i32_1 = arith.constant 0 : i32
    %c0_i32_2 = arith.constant 0 : i32
    return %c0_i32, %c0_i32_0, %c0_i32_1 : i32, i32, i32
  }
  func.func @transform_2(%arg0: i32) -> (i32, i32) {
    %c0_i32 = arith.constant 0 : i32
    %c0_i32_0 = arith.constant 0 : i32
    %c0_i32_1 = arith.constant 0 : i32
    return %c0_i32, %c0_i32_0 : i32, i32
  }
  func.func @transform_3(%arg0: i32) -> (i32, i32, i32) {
    %c0_i32 = arith.constant 0 : i32
    %c0_i32_0 = arith.constant 0 : i32
    %c0_i32_1 = arith.constant 0 : i32
    return %arg0, %c0_i32, %c0_i32_0 : i32, i32, i32
  }
}

</mosaic_0001>

<bundles_post_ra>
// kernel: conv_block.2
= control target key start
LH: loop header
LB: loop body
LE: loop exit
PB: predicated region body
PF: predicated region fallthrough
CT: control target
= control target key end

     0   :  { %s1587_s12 = smov 0   ;;  %s1764_s0 = inlined_call_operand.vmem [shape: bf16[2,4,342], index: 0, kind: input, shape index: {}]   ;;  %s1765_s1 = inlined_call_operand.vmem [shape: bf16[9,8,4], index: 1, kind: input, shape index: {}]   ;;  %s1766_s2 = inlined_call_operand.vmem [shape: f32[8,1], index: 2, kind: input, shape index: {}]   ;;  %s1767_s3 = inlined_call_operand.vmem [shape: bf16[2,8,288], index: 3, kind: output, shape index: {}]  }
   0x1 LB: > { %s1390_s13 = sadd.s32 4294967295, %s1553_s12   ;;  %p1394_p0 = scmp.ge.s32.totalorder %s1553_s12, 1  ;;  %s1553_s12 = sphi %s1587_s12, %s13_s12  }
   0x2   : > { %p137_p1 = scmp.lt.s32.totalorder %s1553_s12, 3 }
   0x4   : > { %p138_p2 = pnand %p1394_p0, %p137_p1 }
   0x5   : > { %p161_p3 = scmp.lt.s32.totalorder (!%p138_p2), %s1390_s13, 1  ;;  %v181_v0 = vlaneseq (!%p138_p2)  ;;  %v1555_v1 = vmov (!%p138_p2), 1983009808   ;;  %v1556_v3 = vmov (!%p138_p2), 0.0   ;;  %vm1557_vm0 = vmmov (!%p138_p2), 0   ;;  %s1559_s18 = smov (!%p138_p2), 127  }
   0x6   : > { %141 = sbr.rel (%p138_p2) target bundleno = 462 (0x1ce), region = 32  ;;  %v179_v2 = vunpack.c.l.s4 (!%p138_p2), %v1555_v1  ;;  %1456 = vmatprep.subr.bf16.mxu1 (!%p138_p2), %v1556_v3  ;;  %1458 = vmatprep.mubr.msk.bf16.mxu1 (!%p138_p2), %vm1557_vm0, %v1556_v3  ;;  %v1558_v6 = vmov (!%p138_p2), 0   ;;  %s1560_s19 = smov (!%p138_p2), 126   ;;  %v1265_v48 = vld [vmem:[%s1766_s2] sm:$0xff] (!%p138_p2)  ;;  %vm206_vm1 = vcmask (!%p138_p2), 1041408   ;;  %vm199_vm2 = vcmask (!%p138_p2), 1039360  }
   0x7   : > { %v182_v4 = vshrl.u32 (!%p138_p2), %v181_v0, 7  ;;  %248 = vmatprep.mubr.bf16.mxu0 (!%p138_p2), %v1558_v6  ;;  %1532 = vset.pattern.permute.xlu0 (!%p138_p2), %v1558_v6  ;;  %s1561_s20 = smov (!%p138_p2), 110   ;;  %s1562_s21 = smov (!%p138_p2), 109   ;;  %v1397_v53 = vld [vmem:[%s1765_s1 + $0x4] sm:$0xf] (!%p138_p2)  ;;  %vm202_vm3 = vcmask (!%p138_p2), 31744  }
   0x8   : > { %v180_v5 = vunpack.c.0.s8 (!%p138_p2), %v179_v2  ;;  %s1563_s22 = smov (!%p138_p2), 108   ;;  %s1564_s23 = smov (!%p138_p2), 92   ;;  %vm416_vm4 = vcmask (!%p138_p2), 1031168   ;;  %v173_v63 = vld [vmem:[%s1765_s1] sm:$0xf] (!%p138_p2)  ;;  %vm541_vm5 = vcmask (!%p138_p2), 900096  }
   0x9   : > { %s1565_s24 = smov (!%p138_p2), 91   ;;  %s1566_s25 = smov (!%p138_p2), 90   ;;  %vm666_vm6 = vcmask (!%p138_p2), 891904   ;;  %vm791_vm7 = vcmask (!%p138_p2), 883712   ;;  %vm916_vm8 = vcmask (!%p138_p2), 752640   ;;  %vm1041_vm9 = vcmask (!%p138_p2), 744448  }
   0xa   : > { %v1603_v7 = vsub.s32 (!%p138_p2), %v180_v5, %v182_v4  ;;  %vm1166_vm10 = vcmask (!%p138_p2), 736256   ;;  %vm1289_vm11 = vcmask (!%p138_p2), 261120   ;;  %vm1333_vm13 = vcmask (!%p138_p2), 257024  }
   0xd   : > { %s1769_s13 = smov (!%p161_p3, %s1390_s13), 1 }
   0xe   : > { %s1510_s14 = smul.u32 6, %s1769_s13 }
  0x10   : > { %s1608_s17 = scalar_lea.vmem %s1764_s0, %s1510_s14 }
  0x11   : > { %v172_v8 = vld [vmem:[%s1608_s17] sm:$0x3f] }
  0x12   : > { %v1612_v9 = vrot.slane %v172_v8, %v1603_v7  ;;  %v177_v10 = vcombine.high %v172_v8, %v172_v8  ;;  %v390_v11 = vld [vmem:[%s1608_s17] sm:$0x3f] }
  0x13   : > { %v401_v14 = vrot.slane %v390_v11, %v1603_v7  ;;  %v394_v15 = vcombine.high %v390_v11, %v390_v11  ;;  %v515_v17 = vld [vmem:[%s1608_s17] sm:$0x3f] }
  0x14   : > { %193 = vrot.lane.b32.xlu0 %v1612_v9, %s1559_s18  ;;  %v1617_v12 = vrot.slane %v177_v10, %v1603_v7  ;;  %v1621_v13 = vcombine.high %v1612_v9, %v1612_v9  ;;  %v526_v19 = vrot.slane %v515_v17, %v1603_v7  ;;  %v519_v20 = vcombine.high %v515_v17, %v515_v17  ;;  %v640_v22 = vld [vmem:[%s1608_s17] sm:$0x3f]  ;;  %v1404_v10 = vld [vmem:[%s1765_s1 + $0x8] sm:$0xf] }
  0x15   : > { %v409_v16 = vcombine.high %v401_v14, %v401_v14  ;;  %v408_v18 = vrot.slane %v394_v15, %v1603_v7  ;;  %v651_v24 = vrot.slane %v640_v22, %v1603_v7  ;;  %v644_v25 = vcombine.high %v640_v22, %v640_v22  ;;  %v765_v27 = vld [vmem:[%s1608_s17] sm:$0x3f] }
  0x16   : > { %197 = vrot.lane.b32.xlu1 %v1617_v12, %s1559_s18  ;;  %v534_v21 = vcombine.high %v526_v19, %v526_v19  ;;  %v533_v23 = vrot.slane %v519_v20, %v1603_v7  ;;  %v776_v29 = vrot.slane %v765_v27, %v1603_v7  ;;  %v769_v30 = vcombine.high %v765_v27, %v765_v27  ;;  %v890_v32 = vld [vmem:[%s1608_s17] sm:$0x3f]  ;;  %v1412_v27 = vld [vmem:[%s1765_s1 + $0x10] sm:$0xf] }
  0x17   : > { %v659_v26 = vcombine.high %v651_v24, %v651_v24  ;;  %v658_v28 = vrot.slane %v644_v25, %v1603_v7  ;;  %v901_v34 = vrot.slane %v890_v32, %v1603_v7  ;;  %v894_v35 = vcombine.high %v890_v32, %v890_v32  ;;  %v1015_v37 = vld [vmem:[%s1608_s17] sm:$0x3f] }
  0x18   : > { %195 = vrot.lane.b32.xlu0 %v1621_v13, %s1559_s18  ;;  %v784_v31 = vcombine.high %v776_v29, %v776_v29  ;;  %v783_v33 = vrot.slane %v769_v30, %v1603_v7  ;;  %v1026_v39 = vrot.slane %v1015_v37, %v1603_v7  ;;  %v1019_v40 = vcombine.high %v1015_v37, %v1015_v37  ;;  %v1140_v42 = vld [vmem:[%s1608_s17] sm:$0x3f] }
  0x19   : > { %v909_v36 = vcombine.high %v901_v34, %v901_v34  ;;  %v908_v38 = vrot.slane %v894_v35, %v1603_v7  ;;  %v1151_v44 = vrot.slane %v1140_v42, %v1603_v7  ;;  %v1144_v45 = vcombine.high %v1140_v42, %v1140_v42  ;;  %v1416_v35 = vld [vmem:[%s1765_s1 + $0x14] sm:$0xf]  ;;  %v1420_v42 = vld [vmem:[%s1765_s1 + $0x18] sm:$0xf] }
  0x1a   : > { %410 = vrot.lane.b32.xlu1 %v401_v14, %s1560_s19  ;;  %v1034_v41 = vcombine.high %v1026_v39, %v1026_v39  ;;  %v1033_v43 = vrot.slane %v1019_v40, %v1603_v7  ;;  %v307_v56 = vsel %vm206_vm1, %v1617_v12, 0  ;;  %v301_v59 = vsel %vm206_vm1, %v1612_v9, 0 }
  0x1b   : > { %v1159_v46 = vcombine.high %v1151_v44, %v1151_v44  ;;  %v1158_v47 = vrot.slane %v1144_v45, %v1603_v7 }
  0x1c   : > { %412 = vrot.lane.b32.xlu0 %v409_v16, %s1560_s19 }
  0x1e   : > { %414 = vrot.lane.b32.xlu1 %v408_v18, %s1560_s19 }
  0x20   : > { %535 = vrot.lane.b32.xlu0 %v526_v19, %s1561_s20  ;;  %v1408_v19 = vld [vmem:[%s1765_s1 + $0xc] sm:$0xf] }
  0x22   : > { %537 = vrot.lane.b32.xlu1 %v534_v21, %s1561_s20 }
  0x24   : > { %539 = vrot.lane.b32.xlu0 %v533_v23, %s1561_s20 }
  0x26   : > { %660 = vrot.lane.b32.xlu1 %v651_v24, %s1562_s21 }
  0x28   : > { %662 = vrot.lane.b32.xlu0 %v659_v26, %s1562_s21 }
  0x2a   : > { %664 = vrot.lane.b32.xlu1 %v658_v28, %s1562_s21  ;;  %s1511_s21 = smul.u32 12, %s1769_s13 }
  0x2c   : > { %785 = vrot.lane.b32.xlu0 %v776_v29, %s1563_s22 }
  0x2e   : > { %787 = vrot.lane.b32.xlu1 %v784_v31, %s1563_s22 }
  0x30   : > { %789 = vrot.lane.b32.xlu0 %v783_v33, %s1563_s22 }
  0x32   : > { %910 = vrot.lane.b32.xlu1 %v901_v34, %s1564_s23 }
  0x34   : > { %912 = vrot.lane.b32.xlu0 %v909_v36, %s1564_s23 }
  0x36   : > { %914 = vrot.lane.b32.xlu1 %v908_v38, %s1564_s23 }
  0x38   : > { %1035 = vrot.lane.b32.xlu0 %v1026_v39, %s1565_s24 }
  0x3a   : > { %1037 = vrot.lane.b32.xlu1 %v1034_v41, %s1565_s24 }
  0x3c   : > { %1039 = vrot.lane.b32.xlu0 %v1033_v43, %s1565_s24  ;;  %s170_s24 = scalar_lea.vmem %s1767_s3, %s1511_s21 }
  0x3e   : > { %1160 = vrot.lane.b32.xlu1 %v1151_v44, %s1566_s25 }
  0x40   : > { %1162 = vrot.lane.b32.xlu0 %v1159_v46, %s1566_s25 }
  0x42   : > { %1164 = vrot.lane.b32.xlu1 %v1158_v47, %s1566_s25 }
  0x44   : > { %1268 = vperm.xlu0 %1532, %v1265_v48  }
  0x86   : > { %v194_v49 = vpop.permute.xlu0 %193 }
  0x88   : > { %v198_v50 = vpop.permute.xlu1 %197 }
  0x89   : > { %v214_v51 = vsel %vm206_vm1, %v198_v50, 0 }
  0x8a   : > { %v196_v52 = vpop.permute.xlu0 %195  ;;  %1457 = vmatpush3.bf16.msra.mxu1 %v214_v51 }
  0x8b   : > { %v201_v54 = vsel %vm199_vm2, %v196_v52, %v198_v50  ;;  %v200_v55 = vsel %vm199_vm2, %v194_v49, %v196_v52  ;;  %1462 = vmatprep.subr.bf16.mxu1 %v1556_v3  ;;  %v1424_v49 = vld [vmem:[%s1765_s1 + $0x1c] sm:$0xf] }
  0x8c   : > { %1398 = vmatprep.subr.msk.bf16.mxu0 %vm206_vm1, %v201_v54  ;;  %v208_v57 = vsel %vm206_vm1, %v200_v55, 0  ;;  %v411_v58 = vpop.permute.xlu1 %410 }
  0x8d   : > { %217 = vmatpush1.bf16.msra.mxu0 %v208_v57  ;;  %1459 = vmatmul.mubr.msk.bf16.vlgmr.msra.gmra.mrb[0].mxu1 %vm202_vm3, %v1397_v53 }
  0x8e   : > { %1401 = vmatprep.subr.msk.bf16.mxu0 %vm206_vm1, %v1621_v13  ;;  %1463 = vmatpush3.bf16.msra.mxu1 %v307_v56  ;;  %v413_v60 = vpop.permute.xlu0 %412 }
  0x8f   : > { %1464 = vmatprep.mubr.msk.bf16.mxu1 %vm1557_vm0, %v1556_v3  ;;  %1468 = vmatprep.subr.bf16.mxu1 %v1556_v3  ;;  %v417_v1 = vsel %vm416_vm4, %v411_v58, %v413_v60 }
  0x90   : > { %1399 = vmatmul.mubr.msk.bf16.vlgmr.msra.gmra.mrb[0].mxu0 %vm202_vm3, %v1397_v53  ;;  %v415_v61 = vpop.permute.xlu1 %414  ;;  %v423_v5 = vsel %vm206_vm1, %v417_v1, 0  ;;  %v1428_v53 = vld [vmem:[%s1765_s1 + $0x20] sm:$0xf] }
  0x91   : > { %310 = vmatpush1.bf16.msra.mxu0 %v301_v59  ;;  %v418_v62 = vsel %vm416_vm4, %v413_v60, %v415_v61  ;;  %341 = vmatprep.mubr.bf16.mxu0 %v1558_v6  ;;  %v429_v2 = vsel %vm206_vm1, %v415_v61, 0 }
  0x92   : > { %1405 = vmatprep.subr.msk.bf16.mxu0 %vm206_vm1, %v418_v62  ;;  %v536_v0 = vpop.permute.xlu0 %535 }
  0x94   : > { %v538_v4 = vpop.permute.xlu1 %537 }
  0x95   : > { %1465 = vmatmul.mubr.msk.bf16.vlgmr.msra.gmra.mrb[4].mxu1 %vm202_vm3, %v173_v63  ;;  %v542_v12 = vsel %vm541_vm5, %v536_v0, %v538_v4 }
  0x96   : > { %1469 = vmatpush3.bf16.msra.mxu1 %v429_v2  ;;  %1470 = vmatprep.mubr.msk.bf16.mxu1 %vm1557_vm0, %v1556_v3  ;;  %v540_v7 = vpop.permute.xlu0 %539  ;;  %v548_v15 = vsel %vm206_vm1, %v542_v12, 0 }
  0x97   : > { %v543_v8 = vsel %vm541_vm5, %v538_v4, %v540_v7  ;;  %1474 = vmatprep.subr.bf16.mxu1 %v1556_v3  ;;  %v554_v13 = vsel %vm206_vm1, %v540_v7, 0 }
  0x98   : > { %1402 = vmatmul.mubr.msk.bf16.vlgmr.msra.gmra.mrb[4].mxu0 %vm202_vm3, %v173_v63  ;;  %v661_v9 = vpop.permute.xlu1 %660 }
  0x99   : > { %432 = vmatpush1.bf16.msra.mxu0 %v423_v5  ;;  %463 = vmatprep.mubr.bf16.mxu0 %v1558_v6 }
  0x9a   : > { %1409 = vmatprep.subr.msk.bf16.mxu0 %vm206_vm1, %v543_v8  ;;  %v663_v11 = vpop.permute.xlu0 %662 }
  0x9b   : > { %v667_v20 = vsel %vm666_vm6, %v661_v9, %v663_v11 }
  0x9c   : > { %v665_v14 = vpop.permute.xlu1 %664  ;;  %v673_v23 = vsel %vm206_vm1, %v667_v20, 0 }
  0x9d   : > { %1471 = vmatmul.mubr.msk.bf16.vlgmr.msra.gmra.mrb[8].mxu1 %vm202_vm3, %v1404_v10  ;;  %v668_v17 = vsel %vm666_vm6, %v663_v11, %v665_v14  ;;  %v679_v21 = vsel %vm206_vm1, %v665_v14, 0 }
  0x9e   : > { %1475 = vmatpush3.bf16.msra.mxu1 %v554_v13  ;;  %1476 = vmatprep.mubr.msk.bf16.mxu1 %vm1557_vm0, %v1556_v3  ;;  %v786_v16 = vpop.permute.xlu0 %785 }
  0x9f   : > { %1480 = vmatprep.subr.bf16.mxu1 %v1556_v3 }
  0xa0   : > { %1406 = vmatmul.mubr.msk.bf16.vlgmr.msra.gmra.mrb[8].mxu0 %vm202_vm3, %v1404_v10  ;;  %v788_v18 = vpop.permute.xlu1 %787 }
  0xa1   : > { %557 = vmatpush1.bf16.msra.mxu0 %v548_v15  ;;  %588 = vmatprep.mubr.bf16.mxu0 %v1558_v6  ;;  %v792_v28 = vsel %vm791_vm7, %v786_v16, %v788_v18 }
  0xa2   : > { %1413 = vmatprep.subr.msk.bf16.mxu0 %vm206_vm1, %v668_v17  ;;  %v790_v22 = vpop.permute.xlu0 %789  ;;  %v798_v31 = vsel %vm206_vm1, %v792_v28, 0 }
  0xa3   : > { %v793_v25 = vsel %vm791_vm7, %v788_v18, %v790_v22  ;;  %v804_v29 = vsel %vm206_vm1, %v790_v22, 0 }
  0xa4   : > { %v911_v24 = vpop.permute.xlu1 %910 }
  0xa5   : > { %1477 = vmatmul.mubr.msk.bf16.vlgmr.msra.gmra.mrb[12].mxu1 %vm202_vm3, %v1408_v19 }
  0xa6   : > { %1481 = vmatpush3.bf16.msra.mxu1 %v679_v21  ;;  %1482 = vmatprep.mubr.msk.bf16.mxu1 %vm1557_vm0, %v1556_v3  ;;  %v913_v26 = vpop.permute.xlu0 %912 }
  0xa7   : > { %1486 = vmatprep.subr.bf16.mxu1 %v1556_v3  ;;  %v917_v36 = vsel %vm916_vm8, %v911_v24, %v913_v26 }
  0xa8   : > { %1410 = vmatmul.mubr.msk.bf16.vlgmr.msra.gmra.mrb[12].mxu0 %vm202_vm3, %v1408_v19  ;;  %v915_v30 = vpop.permute.xlu1 %914  ;;  %v923_v39 = vsel %vm206_vm1, %v917_v36, 0 }
  0xa9   : > { %682 = vmatpush1.bf16.msra.mxu0 %v673_v23  ;;  %713 = vmatprep.mubr.bf16.mxu0 %v1558_v6  ;;  %v918_v33 = vsel %vm916_vm8, %v913_v26, %v915_v30  ;;  %v929_v37 = vsel %vm206_vm1, %v915_v30, 0 }
  0xaa   : > { %1417 = vmatprep.subr.msk.bf16.mxu0 %vm206_vm1, %v793_v25  ;;  %v1036_v32 = vpop.permute.xlu0 %1035 }
  0xac   : > { %v1038_v34 = vpop.permute.xlu1 %1037 }
  0xad   : > { %1483 = vmatmul.mubr.msk.bf16.vlgmr.msra.gmra.mrb[16].mxu1 %vm202_vm3, %v1412_v27  ;;  %v1042_v43 = vsel %vm1041_vm9, %v1036_v32, %v1038_v34 }
  0xae   : > { %1487 = vmatpush3.bf16.msra.mxu1 %v804_v29  ;;  %1488 = vmatprep.mubr.msk.bf16.mxu1 %vm1557_vm0, %v1556_v3  ;;  %v1040_v38 = vpop.permute.xlu0 %1039  ;;  %v1048_v47 = vsel %vm206_vm1, %v1042_v43, 0 }
  0xaf   : > { %1492 = vmatprep.subr.bf16.mxu1 %v1556_v3  ;;  %v1043_v41 = vsel %vm1041_vm9, %v1038_v34, %v1040_v38  ;;  %v1054_v44 = vsel %vm206_vm1, %v1040_v38, 0 }
  0xb0   : > { %1414 = vmatmul.mubr.msk.bf16.vlgmr.msra.gmra.mrb[16].mxu0 %vm202_vm3, %v1412_v27  ;;  %v1161_v40 = vpop.permute.xlu1 %1160 }
  0xb1   : > { %807 = vmatpush1.bf16.msra.mxu0 %v798_v31  ;;  %838 = vmatprep.mubr.bf16.mxu0 %v1558_v6 }
  0xb2   : > { %1421 = vmatprep.subr.msk.bf16.mxu0 %vm206_vm1, %v918_v33  ;;  %v1163_v45 = vpop.permute.xlu0 %1162 }
  0xb3   : > { %v1167_v50 = vsel %vm1166_vm10, %v1161_v40, %v1163_v45 }
  0xb4   : > { %v1165_v46 = vpop.permute.xlu1 %1164  ;;  %v1173_v52 = vsel %vm206_vm1, %v1167_v50, 0 }
  0xb5   : > { %1489 = vmatmul.mubr.msk.bf16.vlgmr.msra.gmra.mrb[20].mxu1 %vm202_vm3, %v1416_v35  ;;  %v1168_v48 = vsel %vm1166_vm10, %v1163_v45, %v1165_v46  ;;  %v1179_v51 = vsel %vm206_vm1, %v1165_v46, 0 }
  0xb6   : > { %1493 = vmatpush3.bf16.msra.mxu1 %v929_v37  ;;  %1494 = vmatprep.mubr.msk.bf16.mxu1 %vm1557_vm0, %v1556_v3 }
  0xb7   : > { %1498 = vmatprep.subr.bf16.mxu1 %v1556_v3 }
  0xb8   : > { %1418 = vmatmul.mubr.msk.bf16.vlgmr.msra.gmra.mrb[20].mxu0 %vm202_vm3, %v1416_v35 }
  0xb9   : > { %932 = vmatpush1.bf16.msra.mxu0 %v923_v39  ;;  %963 = vmatprep.mubr.bf16.mxu0 %v1558_v6 }
  0xba   : > { %1425 = vmatprep.subr.msk.bf16.mxu0 %vm206_vm1, %v1043_v41 }
  0xbd   : > { %1495 = vmatmul.mubr.msk.bf16.vlgmr.msra.gmra.mrb[24].mxu1 %vm202_vm3, %v1420_v42 }
  0xbe   : > { %1499 = vmatpush3.bf16.msra.mxu1 %v1054_v44  ;;  %1500 = vmatprep.mubr.msk.bf16.mxu1 %vm1557_vm0, %v1556_v3 }
  0xbf   : > { %1504 = vmatprep.subr.bf16.mxu1 %v1556_v3 }
  0xc0   : > { %1422 = vmatmul.mubr.msk.bf16.vlgmr.msra.gmra.mrb[24].mxu0 %vm202_vm3, %v1420_v42 }
  0xc1   : > { %1057 = vmatpush1.bf16.msra.mxu0 %v1048_v47  ;;  %1088 = vmatprep.mubr.bf16.mxu0 %v1558_v6 }
  0xc2   : > { %1429 = vmatprep.subr.msk.bf16.mxu0 %vm206_vm1, %v1168_v48 }
  0xc5   : > { %1501 = vmatmul.mubr.msk.bf16.vlgmr.msra.gmra.mrb[28].mxu1 %vm202_vm3, %v1424_v49 }
  0xc6   : > { %1505 = vmatpush3.bf16.msra.mxu1 %v1179_v51  ;;  %1506 = vmatprep.mubr.msk.bf16.mxu1 %vm1557_vm0, %v1556_v3 }
  0xc8   : > { %1426 = vmatmul.mubr.msk.bf16.vlgmr.msra.gmra.mrb[28].mxu0 %vm202_vm3, %v1424_v49 }
  0xc9   : > { %1182 = vmatpush1.bf16.msra.mxu0 %v1173_v52  ;;  %1213 = vmatprep.mubr.bf16.mxu0 %v1558_v6 }
  0xcd   : > { %1507 = vmatmul.mubr.msk.bf16.vlgmr.msra.gmra.mrb[32].mxu1 %vm202_vm3, %v1428_v53 }
  0xd0   : > { %1430 = vmatmul.mubr.msk.bf16.vlgmr.msra.gmra.mrb[32].mxu0 %vm202_vm3, %v1428_v53 }
 0x160   : > { %v291_v54 = vpop.f32.mrb[0].mxu1 }
 0x161   : > { %v1460_v55 = vpop.f32.mrb[1].mxu1 }
 0x162   : > { %v294_v56 = vpop.f32.mrb[2].mxu1 }
 0x163   : > { %v250_v57 = vpop.f32.mrb[0].mxu0  ;;  %v1461_v58 = vpop.f32.mrb[3].mxu1 }
 0x164   : > { %v252_v59 = vpop.f32.mrb[1].mxu0 }
 0x165   : > { %v254_v3 = vpop.f32.mrb[2].mxu0 }
 0x166   : > { %v255_v60 = vpop.f32.mrb[3].mxu0 }
 0x168   : > { %v384_v61 = vpop.f32.mrb[4].mxu1 }
 0x169   : > { %v385_v62 = vadd.f32 %v384_v61, %v291_v54  ;;  %v1466_v63 = vpop.f32.mrb[5].mxu1 }
 0x16a   : > { %v387_v6 = vpop.f32.mrb[6].mxu1 }
 0x16b   : > { %v343_v0 = vpop.f32.mrb[4].mxu0  ;;  %v1467_v1 = vpop.f32.mrb[7].mxu1 }
 0x16c   : > { %v344_v2 = vadd.f32 %v343_v0, %v250_v57  ;;  %v345_v4 = vpop.f32.mrb[5].mxu0 }
 0x16d   : > { %v346_v5 = vadd.f32 %v345_v4, %v252_v59  ;;  %v347_v7 = vpop.f32.mrb[6].mxu0 }
 0x16e   : > { %v348_v8 = vpop.f32.mrb[7].mxu0 }
 0x170   : > { %v506_v9 = vpop.f32.mrb[8].mxu1 }
 0x171   : > { %v514_v10 = vadd.f32 %v506_v9, %v385_v62  ;;  %v1472_v11 = vpop.f32.mrb[9].mxu1 }
 0x172   : > { %v509_v12 = vpop.f32.mrb[10].mxu1 }
 0x173   : > { %v465_v13 = vpop.f32.mrb[8].mxu0  ;;  %v1473_v14 = vpop.f32.mrb[11].mxu1 }
 0x174   : > { %v512_v15 = vadd.f32 %v465_v13, %v344_v2  ;;  %v467_v16 = vpop.f32.mrb[9].mxu0  ;;  %v1269_v12 = vpop.permute.xlu0 %1268 }
 0x175   : > { %v513_v17 = vadd.f32 %v467_v16, %v346_v5  ;;  %v469_v18 = vpop.f32.mrb[10].mxu0 }
 0x176   : > { %v470_v19 = vpop.f32.mrb[11].mxu0 }
 0x178   : > { %v631_v20 = vpop.f32.mrb[12].mxu1 }
 0x179   : > { %v639_v21 = vadd.f32 %v631_v20, %v514_v10  ;;  %v1478_v22 = vpop.f32.mrb[13].mxu1 }
 0x17a   : > { %v634_v23 = vpop.f32.mrb[14].mxu1 }
 0x17b   : > { %v590_v24 = vpop.f32.mrb[12].mxu0  ;;  %v1479_v25 = vpop.f32.mrb[15].mxu1 }
 0x17c   : > { %v637_v26 = vadd.f32 %v590_v24, %v512_v15  ;;  %v592_v27 = vpop.f32.mrb[13].mxu0 }
 0x17d   : > { %v638_v28 = vadd.f32 %v592_v27, %v513_v17  ;;  %v594_v29 = vpop.f32.mrb[14].mxu0 }
 0x17e   : > { %v595_v30 = vpop.f32.mrb[15].mxu0 }
 0x180   : > { %v756_v31 = vpop.f32.mrb[16].mxu1 }
 0x181   : > { %v764_v32 = vadd.f32 %v756_v31, %v639_v21  ;;  %v1484_v33 = vpop.f32.mrb[17].mxu1 }
 0x182   : > { %v759_v34 = vpop.f32.mrb[18].mxu1 }
 0x183   : > { %v715_v35 = vpop.f32.mrb[16].mxu0  ;;  %v1485_v36 = vpop.f32.mrb[19].mxu1 }
 0x184   : > { %v762_v37 = vadd.f32 %v715_v35, %v637_v26  ;;  %v717_v38 = vpop.f32.mrb[17].mxu0 }
 0x185   : > { %v763_v39 = vadd.f32 %v717_v38, %v638_v28  ;;  %v719_v40 = vpop.f32.mrb[18].mxu0 }
 0x186   : > { %v720_v41 = vpop.f32.mrb[19].mxu0 }
 0x188   : > { %v881_v42 = vpop.f32.mrb[20].mxu1 }
 0x189   : > { %v889_v43 = vadd.f32 %v881_v42, %v764_v32  ;;  %v1490_v44 = vpop.f32.mrb[21].mxu1 }
 0x18a   : > { %v884_v45 = vpop.f32.mrb[22].mxu1 }
 0x18b   : > { %v840_v46 = vpop.f32.mrb[20].mxu0  ;;  %v1491_v47 = vpop.f32.mrb[23].mxu1 }
 0x18c   : > { %v887_v48 = vadd.f32 %v840_v46, %v762_v37  ;;  %v842_v49 = vpop.f32.mrb[21].mxu0 }
 0x18d   : > { %v888_v50 = vadd.f32 %v842_v49, %v763_v39  ;;  %v844_v51 = vpop.f32.mrb[22].mxu0 }
 0x18e   : > { %v845_v52 = vpop.f32.mrb[23].mxu0 }
 0x190   : > { %v1006_v53 = vpop.f32.mrb[24].mxu1 }
 0x191   : > { %v1014_v54 = vadd.f32 %v1006_v53, %v889_v43  ;;  %v1496_v55 = vpop.f32.mrb[25].mxu1 }
 0x192   : > { %v1009_v56 = vpop.f32.mrb[26].mxu1 }
 0x193   : > { %v965_v57 = vpop.f32.mrb[24].mxu0  ;;  %v1497_v58 = vpop.f32.mrb[27].mxu1 }
 0x194   : > { %v1012_v59 = vadd.f32 %v965_v57, %v887_v48  ;;  %v967_v3 = vpop.f32.mrb[25].mxu0 }
 0x195   : > { %v1013_v60 = vadd.f32 %v967_v3, %v888_v50  ;;  %v969_v61 = vpop.f32.mrb[26].mxu0 }
 0x196   : > { %v970_v62 = vpop.f32.mrb[27].mxu0 }
 0x198   : > { %v1131_v63 = vpop.f32.mrb[28].mxu1 }
 0x199   : > { %v1139_v6 = vadd.f32 %v1131_v63, %v1014_v54  ;;  %v1502_v0 = vpop.f32.mrb[29].mxu1 }
 0x19a   : > { %v1134_v1 = vpop.f32.mrb[30].mxu1 }
 0x19b   : > { %v1090_v2 = vpop.f32.mrb[28].mxu0  ;;  %v1503_v4 = vpop.f32.mrb[31].mxu1 }
 0x19c   : > { %v1137_v5 = vadd.f32 %v1090_v2, %v1012_v59  ;;  %v1092_v7 = vpop.f32.mrb[29].mxu0 }
 0x19d   : > { %v1138_v8 = vadd.f32 %v1092_v7, %v1013_v60  ;;  %v1094_v9 = vpop.f32.mrb[30].mxu0 }
 0x19e   : > { %v1095_v10 = vpop.f32.mrb[31].mxu0 }
 0x1a0   : > { %v1256_v11 = vpop.f32.mrb[32].mxu1 }
 0x1a1   : > { %v1264_v13 = vadd.f32 %v1256_v11, %v1139_v6  ;;  %v1508_v14 = vpop.f32.mrb[33].mxu1 }
 0x1a2   : > { %v1259_v15 = vpop.f32.mrb[34].mxu1 }
 0x1a3   : > { %v1273_v16 = vadd.f32 %v1269_v12, %v1264_v13  ;;  %v1215_v17 = vpop.f32.mrb[32].mxu0  ;;  %v1509_v18 = vpop.f32.mrb[35].mxu1 }
 0x1a4   : > { %v1262_v19 = vadd.f32 %v1215_v17, %v1137_v5  ;;  %v1217_v20 = vpop.f32.mrb[33].mxu0 }
 0x1a5   : > { %v1276_v21 = vmul.f32 %v1273_v16, %v1273_v16  ;;  %v1263_v22 = vadd.f32 %v1217_v20, %v1138_v8  ;;  %v1219_v23 = vpop.f32.mrb[34].mxu0 }
 0x1a6   : > { %v1271_v24 = vadd.f32 %v1269_v12, %v1262_v19  ;;  %v1220_v25 = vpop.f32.mrb[35].mxu0 }
 0x1a7   : > { %v1290_v26 = vsel %vm1289_vm11, %v1276_v21, 0.0  ;;  %v1272_v27 = vadd.f32 %v1269_v12, %v1263_v22 }
 0x1a8   : > { %v1291_v28 = vrot.slane %v1290_v26, 4  ;;  %v1274_v29 = vmul.f32 %v1271_v24, %v1271_v24 }
 0x1a9   : > { %v1275_v30 = vmul.f32 %v1272_v27, %v1272_v27 }
 0x1aa   : > { %v1292_v31 = vadd.f32 %v1291_v28, %v1290_v26  ;;  %v1277_v32 = vrot.slane %v1274_v29, 4 }
 0x1ab   : > { %v1283_v33 = vrot.slane %v1275_v30, 4 }
 0x1ac   : > { %v1293_v34 = vrot.slane %v1292_v31, 2  ;;  %v1278_v35 = vadd.f32 %v1277_v32, %v1274_v29 }
 0x1ad   : > { %v1284_v36 = vadd.f32 %v1283_v33, %v1275_v30 }
 0x1ae   : > { %v1294_v37 = vadd.f32 %v1293_v34, %v1292_v31  ;;  %v1279_v38 = vrot.slane %v1278_v35, 2 }
 0x1af   : > { %v1285_v39 = vrot.slane %v1284_v36, 2 }
 0x1b0   : > { %v1295_v40 = vrot.slane %v1294_v37, 1  ;;  %v1280_v41 = vadd.f32 %v1279_v38, %v1278_v35 }
 0x1b1   : > { %v1286_v42 = vadd.f32 %v1285_v39, %v1284_v36 }
 0x1b2   : > { %v1296_v43 = vadd.f32 %v1295_v40, %v1294_v37  ;;  %v1281_v44 = vrot.slane %v1280_v41, 1 }
 0x1b3   : > { %v1287_v45 = vrot.slane %v1286_v42, 1 }
 0x1b4   : > { %v1300_v46 = vmul.f32 0.125, %v1296_v43  ;;  %v1282_v47 = vadd.f32 %v1281_v44, %v1280_v41 }
 0x1b5   : > { %v1288_v48 = vadd.f32 %v1287_v45, %v1286_v42 }
 0x1b6   : > { %v1303_v49 = vadd.f32 1e-08, %v1300_v46  ;;  %v1298_v50 = vmul.f32 0.125, %v1282_v47 }
 0x1b7   : > { %v1299_v51 = vmul.f32 0.125, %v1288_v48 }
 0x1b8   : > { %1541 = vrsqrt.f32 %v1303_v49  ;;  %v1301_v52 = vadd.f32 1e-08, %v1298_v50 }
 0x1b9   : > { %v1302_v53 = vadd.f32 1e-08, %v1299_v51 }
 0x1ba   : > { %1543 = vrsqrt.f32 %v1301_v52 }
 0x1bb   : > { %1545 = vrsqrt.f32 %v1302_v53 }
 0x1c2   : > { %v1542_v54 = vpop.eup %1541 }
 0x1c3   : > { %v1309_v55 = vmul.f32 %v1542_v54, %v1273_v16 }
 0x1c4   : > { %v1544_v56 = vpop.eup %1543 }
 0x1c5   : > { %v1546_v57 = vpop.eup %1545  ;;  %vm1312_vm12 = vcmp.gt.f32.partialorder %v1309_v55, 0.0  ;;  %v1315_v58 = vmul.f32 0.2, %v1309_v55  ;;  %v1307_v59 = vmul.f32 %v1544_v56, %v1271_v24 }
 0x1c6   : > { %v1308_v3 = vmul.f32 %v1546_v57, %v1272_v27 }
 0x1c7   : > { %v1318_v60 = vsel %vm1312_vm12, %v1309_v55, %v1315_v58  ;;  %vm1310_vm14 = vcmp.gt.f32.partialorder %v1307_v59, 0.0  ;;  %v1313_v61 = vmul.f32 0.2, %v1307_v59 }
 0x1c8   : > { %v1437_v62 = vpack.c.bf16 %v1318_v60, %v1318_v60  ;;  %vm1311_vm15 = vcmp.gt.f32.partialorder %v1308_v3, 0.0  ;;  %v1314_v63 = vmul.f32 0.2, %v1308_v3 }
 0x1c9   : > { %v1316_v6 = vsel %vm1310_vm14, %v1307_v59, %v1313_v61 }
 0x1ca   : > { %1334 = vst.msk [vmem:[%s170_s24 + $0x8] sm:$0xf] %vm1333_vm13, %v1437_v62  ;;  %v1317_v0 = vsel %vm1311_vm15, %v1308_v3, %v1314_v63 }
 0x1cb   : > { %v1436_v1 = vpack.c.bf16 %v1317_v0, %v1316_v6 }
 0x1cd   : > { %1332 = vst [vmem:[%s170_s24] sm:$0xff] %v1436_v1 }
 0x1ce PF: > { %s13_s12 = sadd.s32 1, %s1553_s12  }
 0x1cf   : > { %p10_p4 = scmp.ge.s32.totalorder %s13_s12, 4  }
 0x1d1   :  { %12 = sbr.rel (!%p10_p4) target bundleno = 1 (0x1), region = 70 }

// kernel: conv_block.3
= control target key start
LH: loop header
LB: loop body
LE: loop exit
PB: predicated region body
PF: predicated region fallthrough
CT: control target
= control target key end

     0   :  { %s1432_s12 = smov 0   ;;  %s1569_s0 = inlined_call_operand.vmem [shape: bf16[2,8,342], index: 0, kind: input, shape index: {}]   ;;  %s1570_s1 = inlined_call_operand.vmem [shape: bf16[9,8,8], index: 1, kind: input, shape index: {}]   ;;  %s1571_s2 = inlined_call_operand.vmem [shape: f32[8,1], index: 2, kind: input, shape index: {}]   ;;  %s1572_s3 = inlined_call_operand.vmem [shape: f32[2,8,288], index: 3, kind: output, shape index: {}]  }
   0x1 LB: > { %s1243_s13 = sadd.s32 4294967295, %s1399_s12   ;;  %p1247_p0 = scmp.ge.s32.totalorder %s1399_s12, 1  ;;  %s1399_s12 = sphi %s1432_s12, %s13_s12  }
   0x2   : > { %p137_p1 = scmp.lt.s32.totalorder %s1399_s12, 3 }
   0x4   : > { %p138_p2 = pnand %p1247_p0, %p137_p1 }
   0x5   : > { %p161_p3 = scmp.lt.s32.totalorder (!%p138_p2), %s1243_s13, 1  ;;  %v1401_v0 = vmov (!%p138_p2), 0.0   ;;  %vm1402_vm0 = vmmov (!%p138_p2), 0   ;;  %v1403_v1 = vmov (!%p138_p2), 0   ;;  %s1404_s18 = smov (!%p138_p2), 127   ;;  %v1131_v6 = vld [vmem:[%s1571_s2] sm:$0xff] (!%p138_p2) }
   0x6   : > { %141 = sbr.rel (%p138_p2) target bundleno = 460 (0x1cc), region = 32  ;;  %1308 = vmatprep.subr.bf16.mxu1 (!%p138_p2), %v1401_v0  ;;  %1310 = vmatprep.mubr.msk.bf16.mxu1 (!%p138_p2), %vm1402_vm0, %v1401_v0  ;;  %s1405_s19 = smov (!%p138_p2), 126   ;;  %vm198_vm1 = vcmask (!%p138_p2), 1043456   ;;  %v1250_v10 = vld [vmem:[%s1570_s1 + $0x4] sm:$0xf] (!%p138_p2)  ;;  %vm194_vm2 = vcmask (!%p138_p2), 64512  }
   0x7   : > { %240 = vmatprep.mubr.bf16.mxu0 (!%p138_p2), %v1403_v1  ;;  %1383 = vset.pattern.permute.xlu0 (!%p138_p2), %v1403_v1  ;;  %s1406_s20 = smov (!%p138_p2), 110   ;;  %s1407_s21 = smov (!%p138_p2), 109   ;;  %vm191_vm3 = vcmask (!%p138_p2), 1039360   ;;  %vm390_vm4 = vcmask (!%p138_p2), 1031168   ;;  %v174_v20 = vld [vmem:[%s1570_s1] sm:$0xf] (!%p138_p2) }
   0x8   : > { %s1408_s22 = smov (!%p138_p2), 108   ;;  %s1409_s23 = smov (!%p138_p2), 92   ;;  %vm497_vm5 = vcmask (!%p138_p2), 900096   ;;  %v1260_v29 = vld [vmem:[%s1570_s1 + $0x8] sm:$0xf] (!%p138_p2)  ;;  %vm604_vm6 = vcmask (!%p138_p2), 891904  }
   0x9   : > { %s1410_s24 = smov (!%p138_p2), 91   ;;  %s1411_s25 = smov (!%p138_p2), 90   ;;  %v1264_v37 = vld [vmem:[%s1570_s1 + $0xc] sm:$0xf] (!%p138_p2)  ;;  %vm711_vm7 = vcmask (!%p138_p2), 883712   ;;  %vm818_vm8 = vcmask (!%p138_p2), 752640  }
   0xa   : > { %v1268_v45 = vld [vmem:[%s1570_s1 + $0x10] sm:$0xf] (!%p138_p2)  ;;  %v1272_v53 = vld [vmem:[%s1570_s1 + $0x14] sm:$0xf] (!%p138_p2)  ;;  %vm925_vm9 = vcmask (!%p138_p2), 744448   ;;  %vm1032_vm10 = vcmask (!%p138_p2), 736256  }
   0xb   : > { %v1276_v61 = vld [vmem:[%s1570_s1 + $0x18] sm:$0xf] (!%p138_p2)  ;;  %vm1155_vm11 = vcmask (!%p138_p2), 261120  }
   0xd   : > { %s1574_s13 = smov (!%p161_p3, %s1243_s13), 1 }
   0xe   : > { %s1362_s14 = smul.u32 12, %s1574_s13 }
  0x10   : > { %s165_s17 = scalar_lea.vmem %s1569_s0, %s1362_s14 }
  0x11   : > { %v1384_v2 = vld [vmem:[%s165_s17 + $0x8] ss:$0 sps:$4 sm:$0xff]   ;;  %v172_v3 = vld [vmem:[%s165_s17] sm:$0xff] }
  0x12   : > { %v1251_v4 = vcombine.low %v172_v3, %v172_v3  ;;  %189 = vrot.lane.b32.xlu1 %v1384_v2, %s1404_s18  ;;  %v1252_v5 = vcombine.high %v172_v3, %v172_v3  ;;  %v299_v11 = vsel %vm198_vm1, %v1384_v2, 0 }
  0x14   : > { %185 = vrot.lane.b32.xlu0 %v1251_v4, %s1404_s18  ;;  %v293_v18 = vsel %vm198_vm1, %v1251_v4, 0 }
  0x16   : > { %384 = vrot.lane.b32.xlu1 %v1251_v4, %s1405_s19 }
  0x18   : > { %187 = vrot.lane.b32.xlu0 %v1252_v5, %s1404_s18 }
  0x1a   : > { %388 = vrot.lane.b32.xlu1 %v1384_v2, %s1405_s19 }
  0x1c   : > { %386 = vrot.lane.b32.xlu0 %v1252_v5, %s1405_s19 }
  0x1e   : > { %493 = vrot.lane.b32.xlu1 %v1252_v5, %s1406_s20 }
  0x20   : > { %491 = vrot.lane.b32.xlu0 %v1251_v4, %s1406_s20 }
  0x22   : > { %598 = vrot.lane.b32.xlu1 %v1251_v4, %s1407_s21 }
  0x24   : > { %495 = vrot.lane.b32.xlu0 %v1384_v2, %s1406_s20 }
  0x26   : > { %602 = vrot.lane.b32.xlu1 %v1384_v2, %s1407_s21 }
  0x28   : > { %600 = vrot.lane.b32.xlu0 %v1252_v5, %s1407_s21  ;;  %s1363_s21 = smul.u32 24, %s1574_s13 }
  0x2a   : > { %707 = vrot.lane.b32.xlu1 %v1252_v5, %s1408_s22 }
  0x2c   : > { %705 = vrot.lane.b32.xlu0 %v1251_v4, %s1408_s22 }
  0x2e   : > { %812 = vrot.lane.b32.xlu1 %v1251_v4, %s1409_s23 }
  0x30   : > { %709 = vrot.lane.b32.xlu0 %v1384_v2, %s1408_s22 }
  0x32   : > { %816 = vrot.lane.b32.xlu1 %v1384_v2, %s1409_s23 }
  0x34   : > { %814 = vrot.lane.b32.xlu0 %v1252_v5, %s1409_s23 }
  0x36   : > { %921 = vrot.lane.b32.xlu1 %v1252_v5, %s1410_s24 }
  0x38   : > { %919 = vrot.lane.b32.xlu0 %v1251_v4, %s1410_s24 }
  0x3a   : > { %1026 = vrot.lane.b32.xlu1 %v1251_v4, %s1411_s25 }
  0x3c   : > { %923 = vrot.lane.b32.xlu0 %v1384_v2, %s1410_s24  ;;  %s170_s24 = scalar_lea.vmem %s1572_s3, %s1363_s21 }
  0x3e   : > { %1030 = vrot.lane.b32.xlu1 %v1384_v2, %s1411_s25 }
  0x40   : > { %1028 = vrot.lane.b32.xlu0 %v1252_v5, %s1411_s25 }
  0x44   : > { %1134 = vperm.xlu0 %1383, %v1131_v6   ;;  %v1280_v6 = vld [vmem:[%s1570_s1 + $0x1c] sm:$0xf] }
  0x84   : > { %v190_v7 = vpop.permute.xlu1 %189 }
  0x85   : > { %v206_v9 = vsel %vm198_vm1, %v190_v7, 0 }
  0x86   : > { %v186_v8 = vpop.permute.xlu0 %185  ;;  %1309 = vmatpush3.bf16.msra.mxu1 %v206_v9 }
  0x87   : > { %1314 = vmatprep.subr.bf16.mxu1 %v1401_v0 }
  0x88   : > { %v385_v12 = vpop.permute.xlu1 %384 }
  0x89   : > { %1311 = vmatmul.mubr.msk.bf16.vlgmr.msra.gmra.mrb[0].mxu1 %vm194_vm2, %v1250_v10 }
  0x8a   : > { %v188_v13 = vpop.permute.xlu0 %187  ;;  %1315 = vmatpush3.bf16.msra.mxu1 %v299_v11  ;;  %1316 = vmatprep.mubr.msk.bf16.mxu1 %vm1402_vm0, %v1401_v0  ;;  %v1284_v11 = vld [vmem:[%s1570_s1 + $0x20] sm:$0xf] }
  0x8b   : > { %v193_v14 = vsel %vm191_vm3, %v188_v13, %v190_v7  ;;  %v192_v15 = vsel %vm191_vm3, %v186_v8, %v188_v13  ;;  %1320 = vmatprep.subr.bf16.mxu1 %v1401_v0 }
  0x8c   : > { %1254 = vmatprep.subr.msk.bf16.mxu0 %vm198_vm1, %v193_v14  ;;  %v200_v16 = vsel %vm198_vm1, %v192_v15, 0  ;;  %v389_v17 = vpop.permute.xlu1 %388 }
  0x8d   : > { %209 = vmatpush1.bf16.msra.mxu0 %v200_v16  ;;  %v403_v22 = vsel %vm198_vm1, %v389_v17, 0 }
  0x8e   : > { %1257 = vmatprep.subr.msk.bf16.mxu0 %vm198_vm1, %v1252_v5  ;;  %v387_v19 = vpop.permute.xlu0 %386 }
  0x8f   : > { %v392_v21 = vsel %vm390_vm4, %v387_v19, %v389_v17  ;;  %v391_v25 = vsel %vm390_vm4, %v385_v12, %v387_v19 }
  0x90   : > { %1255 = vmatmul.mubr.msk.bf16.vlgmr.msra.gmra.mrb[0].mxu0 %vm194_vm2, %v1250_v10  ;;  %v494_v23 = vpop.permute.xlu1 %493  ;;  %v397_v26 = vsel %vm198_vm1, %v391_v25, 0 }
  0x91   : > { %302 = vmatpush1.bf16.msra.mxu0 %v293_v18  ;;  %333 = vmatprep.mubr.bf16.mxu0 %v1403_v1 }
  0x92   : > { %1317 = vmatmul.mubr.msk.bf16.vlgmr.msra.gmra.mrb[4].mxu1 %vm194_vm2, %v174_v20  ;;  %1261 = vmatprep.subr.msk.bf16.mxu0 %vm198_vm1, %v392_v21  ;;  %v492_v24 = vpop.permute.xlu0 %491 }
  0x93   : > { %1321 = vmatpush3.bf16.msra.mxu1 %v403_v22  ;;  %1322 = vmatprep.mubr.msk.bf16.mxu1 %vm1402_vm0, %v1401_v0  ;;  %v498_v33 = vsel %vm497_vm5, %v492_v24, %v494_v23 }
  0x94   : > { %1326 = vmatprep.subr.bf16.mxu1 %v1401_v0  ;;  %v599_v28 = vpop.permute.xlu1 %598  ;;  %v504_v35 = vsel %vm198_vm1, %v498_v33, 0 }
  0x96   : > { %v496_v27 = vpop.permute.xlu0 %495 }
  0x97   : > { %v499_v30 = vsel %vm497_vm5, %v494_v23, %v496_v27  ;;  %v510_v31 = vsel %vm198_vm1, %v496_v27, 0 }
  0x98   : > { %1258 = vmatmul.mubr.msk.bf16.vlgmr.msra.gmra.mrb[4].mxu0 %vm194_vm2, %v174_v20  ;;  %v603_v34 = vpop.permute.xlu1 %602 }
  0x99   : > { %406 = vmatpush1.bf16.msra.mxu0 %v397_v26  ;;  %437 = vmatprep.mubr.bf16.mxu0 %v1403_v1  ;;  %v617_v39 = vsel %vm198_vm1, %v603_v34, 0 }
  0x9a   : > { %1323 = vmatmul.mubr.msk.bf16.vlgmr.msra.gmra.mrb[8].mxu1 %vm194_vm2, %v1260_v29  ;;  %1265 = vmatprep.subr.msk.bf16.mxu0 %vm198_vm1, %v499_v30  ;;  %v601_v32 = vpop.permute.xlu0 %600 }
  0x9b   : > { %1327 = vmatpush3.bf16.msra.mxu1 %v510_v31  ;;  %1328 = vmatprep.mubr.msk.bf16.mxu1 %vm1402_vm0, %v1401_v0  ;;  %v606_v38 = vsel %vm604_vm6, %v601_v32, %v603_v34  ;;  %v605_v41 = vsel %vm604_vm6, %v599_v28, %v601_v32 }
  0x9c   : > { %1332 = vmatprep.subr.bf16.mxu1 %v1401_v0  ;;  %v708_v40 = vpop.permute.xlu1 %707  ;;  %v611_v43 = vsel %vm198_vm1, %v605_v41, 0 }
  0x9e   : > { %v706_v36 = vpop.permute.xlu0 %705 }
  0x9f   : > { %v712_v49 = vsel %vm711_vm7, %v706_v36, %v708_v40 }
  0xa0   : > { %1262 = vmatmul.mubr.msk.bf16.vlgmr.msra.gmra.mrb[8].mxu0 %vm194_vm2, %v1260_v29  ;;  %v813_v44 = vpop.permute.xlu1 %812  ;;  %v718_v51 = vsel %vm198_vm1, %v712_v49, 0 }
  0xa1   : > { %513 = vmatpush1.bf16.msra.mxu0 %v504_v35  ;;  %544 = vmatprep.mubr.bf16.mxu0 %v1403_v1 }
  0xa2   : > { %1329 = vmatmul.mubr.msk.bf16.vlgmr.msra.gmra.mrb[12].mxu1 %vm194_vm2, %v1264_v37  ;;  %1269 = vmatprep.subr.msk.bf16.mxu0 %vm198_vm1, %v606_v38  ;;  %v710_v42 = vpop.permute.xlu0 %709 }
  0xa3   : > { %1333 = vmatpush3.bf16.msra.mxu1 %v617_v39  ;;  %1334 = vmatprep.mubr.msk.bf16.mxu1 %vm1402_vm0, %v1401_v0  ;;  %v713_v46 = vsel %vm711_vm7, %v708_v40, %v710_v42  ;;  %v724_v47 = vsel %vm198_vm1, %v710_v42, 0 }
  0xa4   : > { %1338 = vmatprep.subr.bf16.mxu1 %v1401_v0  ;;  %v817_v50 = vpop.permute.xlu1 %816 }
  0xa5   : > { %v831_v55 = vsel %vm198_vm1, %v817_v50, 0 }
  0xa6   : > { %v815_v48 = vpop.permute.xlu0 %814 }
  0xa7   : > { %v820_v54 = vsel %vm818_vm8, %v815_v48, %v817_v50  ;;  %v819_v57 = vsel %vm818_vm8, %v813_v44, %v815_v48 }
  0xa8   : > { %1266 = vmatmul.mubr.msk.bf16.vlgmr.msra.gmra.mrb[12].mxu0 %vm194_vm2, %v1264_v37  ;;  %v922_v56 = vpop.permute.xlu1 %921  ;;  %v825_v59 = vsel %vm198_vm1, %v819_v57, 0 }
  0xa9   : > { %620 = vmatpush1.bf16.msra.mxu0 %v611_v43  ;;  %651 = vmatprep.mubr.bf16.mxu0 %v1403_v1 }
  0xaa   : > { %1335 = vmatmul.mubr.msk.bf16.vlgmr.msra.gmra.mrb[16].mxu1 %vm194_vm2, %v1268_v45  ;;  %1273 = vmatprep.subr.msk.bf16.mxu0 %vm198_vm1, %v713_v46  ;;  %v920_v52 = vpop.permute.xlu0 %919 }
  0xab   : > { %1339 = vmatpush3.bf16.msra.mxu1 %v724_v47  ;;  %1340 = vmatprep.mubr.msk.bf16.mxu1 %vm1402_vm0, %v1401_v0  ;;  %v926_v2 = vsel %vm925_vm9, %v920_v52, %v922_v56 }
  0xac   : > { %1344 = vmatprep.subr.bf16.mxu1 %v1401_v0  ;;  %v1027_v60 = vpop.permute.xlu1 %1026  ;;  %v932_v5 = vsel %vm198_vm1, %v926_v2, 0 }
  0xae   : > { %v924_v58 = vpop.permute.xlu0 %923 }
  0xaf   : > { %v927_v62 = vsel %vm925_vm9, %v922_v56, %v924_v58  ;;  %v938_v63 = vsel %vm198_vm1, %v924_v58, 0 }
  0xb0   : > { %1270 = vmatmul.mubr.msk.bf16.vlgmr.msra.gmra.mrb[16].mxu0 %vm194_vm2, %v1268_v45  ;;  %v1031_v4 = vpop.permute.xlu1 %1030 }
  0xb1   : > { %727 = vmatpush1.bf16.msra.mxu0 %v718_v51  ;;  %758 = vmatprep.mubr.bf16.mxu0 %v1403_v1  ;;  %v1045_v8 = vsel %vm198_vm1, %v1031_v4, 0 }
  0xb2   : > { %1341 = vmatmul.mubr.msk.bf16.vlgmr.msra.gmra.mrb[20].mxu1 %vm194_vm2, %v1272_v53  ;;  %1277 = vmatprep.subr.msk.bf16.mxu0 %vm198_vm1, %v820_v54  ;;  %v1029_v3 = vpop.permute.xlu0 %1028 }
  0xb3   : > { %1345 = vmatpush3.bf16.msra.mxu1 %v831_v55  ;;  %1346 = vmatprep.mubr.msk.bf16.mxu1 %vm1402_vm0, %v1401_v0  ;;  %v1034_v7 = vsel %vm1032_vm10, %v1029_v3, %v1031_v4  ;;  %v1033_v9 = vsel %vm1032_vm10, %v1027_v60, %v1029_v3 }
  0xb4   : > { %1350 = vmatprep.subr.bf16.mxu1 %v1401_v0  ;;  %v1039_v10 = vsel %vm198_vm1, %v1033_v9, 0 }
  0xb8   : > { %1274 = vmatmul.mubr.msk.bf16.vlgmr.msra.gmra.mrb[20].mxu0 %vm194_vm2, %v1272_v53 }
  0xb9   : > { %834 = vmatpush1.bf16.msra.mxu0 %v825_v59  ;;  %865 = vmatprep.mubr.bf16.mxu0 %v1403_v1 }
  0xba   : > { %1347 = vmatmul.mubr.msk.bf16.vlgmr.msra.gmra.mrb[24].mxu1 %vm194_vm2, %v1276_v61  ;;  %1281 = vmatprep.subr.msk.bf16.mxu0 %vm198_vm1, %v927_v62 }
  0xbb   : > { %1351 = vmatpush3.bf16.msra.mxu1 %v938_v63  ;;  %1352 = vmatprep.mubr.msk.bf16.mxu1 %vm1402_vm0, %v1401_v0 }
  0xbc   : > { %1356 = vmatprep.subr.bf16.mxu1 %v1401_v0 }
  0xc0   : > { %1278 = vmatmul.mubr.msk.bf16.vlgmr.msra.gmra.mrb[24].mxu0 %vm194_vm2, %v1276_v61 }
  0xc1   : > { %941 = vmatpush1.bf16.msra.mxu0 %v932_v5  ;;  %972 = vmatprep.mubr.bf16.mxu0 %v1403_v1 }
  0xc2   : > { %1353 = vmatmul.mubr.msk.bf16.vlgmr.msra.gmra.mrb[28].mxu1 %vm194_vm2, %v1280_v6  ;;  %1285 = vmatprep.subr.msk.bf16.mxu0 %vm198_vm1, %v1034_v7 }
  0xc3   : > { %1357 = vmatpush3.bf16.msra.mxu1 %v1045_v8  ;;  %1358 = vmatprep.mubr.msk.bf16.mxu1 %vm1402_vm0, %v1401_v0 }
  0xc8   : > { %1282 = vmatmul.mubr.msk.bf16.vlgmr.msra.gmra.mrb[28].mxu0 %vm194_vm2, %v1280_v6 }
  0xc9   : > { %1048 = vmatpush1.bf16.msra.mxu0 %v1039_v10  ;;  %1079 = vmatprep.mubr.bf16.mxu0 %v1403_v1 }
  0xca   : > { %1359 = vmatmul.mubr.msk.bf16.vlgmr.msra.gmra.mrb[32].mxu1 %vm194_vm2, %v1284_v11 }
  0xd0   : > { %1286 = vmatmul.mubr.msk.bf16.vlgmr.msra.gmra.mrb[32].mxu0 %vm194_vm2, %v1284_v11 }
 0x15c   : > { %v283_v12 = vpop.f32.mrb[0].mxu1 }
 0x15d   : > { %v1312_v13 = vpop.f32.mrb[1].mxu1 }
 0x15e   : > { %v286_v14 = vpop.f32.mrb[2].mxu1 }
 0x15f   : > { %v1313_v15 = vpop.f32.mrb[3].mxu1 }
 0x163   : > { %v242_v0 = vpop.f32.mrb[0].mxu0 }
 0x164   : > { %v244_v16 = vpop.f32.mrb[1].mxu0 }
 0x165   : > { %v246_v17 = vpop.f32.mrb[2].mxu0  ;;  %v376_v18 = vpop.f32.mrb[4].mxu1 }
 0x166   : > { %v247_v19 = vpop.f32.mrb[3].mxu0  ;;  %v377_v20 = vadd.f32 %v376_v18, %v283_v12  ;;  %v1318_v21 = vpop.f32.mrb[5].mxu1 }
 0x167   : > { %v379_v22 = vpop.f32.mrb[6].mxu1 }
 0x168   : > { %v1319_v23 = vpop.f32.mrb[7].mxu1 }
 0x16b   : > { %v335_v24 = vpop.f32.mrb[4].mxu0 }
 0x16c   : > { %v336_v25 = vadd.f32 %v335_v24, %v242_v0  ;;  %v337_v1 = vpop.f32.mrb[5].mxu0 }
 0x16d   : > { %v338_v26 = vadd.f32 %v337_v1, %v244_v16  ;;  %v339_v27 = vpop.f32.mrb[6].mxu0  ;;  %v480_v28 = vpop.f32.mrb[8].mxu1 }
 0x16e   : > { %v340_v29 = vpop.f32.mrb[7].mxu0  ;;  %v488_v30 = vadd.f32 %v480_v28, %v377_v20  ;;  %v1324_v31 = vpop.f32.mrb[9].mxu1 }
 0x16f   : > { %v483_v32 = vpop.f32.mrb[10].mxu1  ;;  %v1135_v28 = vpop.permute.xlu0 %1134 }
 0x170   : > { %v1325_v33 = vpop.f32.mrb[11].mxu1 }
 0x173   : > { %v439_v34 = vpop.f32.mrb[8].mxu0 }
 0x174   : > { %v486_v35 = vadd.f32 %v439_v34, %v336_v25  ;;  %v441_v36 = vpop.f32.mrb[9].mxu0 }
 0x175   : > { %v487_v37 = vadd.f32 %v441_v36, %v338_v26  ;;  %v443_v38 = vpop.f32.mrb[10].mxu0  ;;  %v587_v39 = vpop.f32.mrb[12].mxu1 }
 0x176   : > { %v444_v40 = vpop.f32.mrb[11].mxu0  ;;  %v595_v41 = vadd.f32 %v587_v39, %v488_v30  ;;  %v1330_v42 = vpop.f32.mrb[13].mxu1 }
 0x177   : > { %v590_v43 = vpop.f32.mrb[14].mxu1 }
 0x178   : > { %v1331_v44 = vpop.f32.mrb[15].mxu1 }
 0x17b   : > { %v546_v45 = vpop.f32.mrb[12].mxu0 }
 0x17c   : > { %v593_v46 = vadd.f32 %v546_v45, %v486_v35  ;;  %v548_v47 = vpop.f32.mrb[13].mxu0 }
 0x17d   : > { %v594_v48 = vadd.f32 %v548_v47, %v487_v37  ;;  %v550_v49 = vpop.f32.mrb[14].mxu0  ;;  %v694_v50 = vpop.f32.mrb[16].mxu1 }
 0x17e   : > { %v551_v51 = vpop.f32.mrb[15].mxu0  ;;  %v702_v52 = vadd.f32 %v694_v50, %v595_v41  ;;  %v1336_v53 = vpop.f32.mrb[17].mxu1 }
 0x17f   : > { %v697_v54 = vpop.f32.mrb[18].mxu1 }
 0x180   : > { %v1337_v55 = vpop.f32.mrb[19].mxu1 }
 0x183   : > { %v653_v56 = vpop.f32.mrb[16].mxu0 }
 0x184   : > { %v700_v57 = vadd.f32 %v653_v56, %v593_v46  ;;  %v655_v58 = vpop.f32.mrb[17].mxu0 }
 0x185   : > { %v701_v59 = vadd.f32 %v655_v58, %v594_v48  ;;  %v657_v60 = vpop.f32.mrb[18].mxu0  ;;  %v801_v61 = vpop.f32.mrb[20].mxu1 }
 0x186   : > { %v658_v62 = vpop.f32.mrb[19].mxu0  ;;  %v809_v63 = vadd.f32 %v801_v61, %v702_v52  ;;  %v1342_v2 = vpop.f32.mrb[21].mxu1 }
 0x187   : > { %v804_v3 = vpop.f32.mrb[22].mxu1 }
 0x188   : > { %v1343_v4 = vpop.f32.mrb[23].mxu1 }
 0x18b   : > { %v760_v5 = vpop.f32.mrb[20].mxu0 }
 0x18c   : > { %v807_v6 = vadd.f32 %v760_v5, %v700_v57  ;;  %v762_v7 = vpop.f32.mrb[21].mxu0 }
 0x18d   : > { %v808_v8 = vadd.f32 %v762_v7, %v701_v59  ;;  %v764_v9 = vpop.f32.mrb[22].mxu0  ;;  %v908_v10 = vpop.f32.mrb[24].mxu1 }
 0x18e   : > { %v765_v11 = vpop.f32.mrb[23].mxu0  ;;  %v916_v12 = vadd.f32 %v908_v10, %v809_v63  ;;  %v1348_v13 = vpop.f32.mrb[25].mxu1 }
 0x18f   : > { %v911_v14 = vpop.f32.mrb[26].mxu1 }
 0x190   : > { %v1349_v15 = vpop.f32.mrb[27].mxu1 }
 0x193   : > { %v867_v0 = vpop.f32.mrb[24].mxu0 }
 0x194   : > { %v914_v16 = vadd.f32 %v867_v0, %v807_v6  ;;  %v869_v17 = vpop.f32.mrb[25].mxu0 }
 0x195   : > { %v915_v18 = vadd.f32 %v869_v17, %v808_v8  ;;  %v871_v19 = vpop.f32.mrb[26].mxu0  ;;  %v1015_v20 = vpop.f32.mrb[28].mxu1 }
 0x196   : > { %v872_v21 = vpop.f32.mrb[27].mxu0  ;;  %v1023_v22 = vadd.f32 %v1015_v20, %v916_v12  ;;  %v1354_v23 = vpop.f32.mrb[29].mxu1 }
 0x197   : > { %v1018_v24 = vpop.f32.mrb[30].mxu1 }
 0x198   : > { %v1355_v25 = vpop.f32.mrb[31].mxu1 }
 0x19b   : > { %v974_v1 = vpop.f32.mrb[28].mxu0 }
 0x19c   : > { %v1021_v26 = vadd.f32 %v974_v1, %v914_v16  ;;  %v976_v27 = vpop.f32.mrb[29].mxu0 }
 0x19d   : > { %v1022_v29 = vadd.f32 %v976_v27, %v915_v18  ;;  %v978_v30 = vpop.f32.mrb[30].mxu0  ;;  %v1122_v31 = vpop.f32.mrb[32].mxu1 }
 0x19e   : > { %v979_v32 = vpop.f32.mrb[31].mxu0  ;;  %v1130_v33 = vadd.f32 %v1122_v31, %v1023_v22  ;;  %v1360_v34 = vpop.f32.mrb[33].mxu1 }
 0x19f   : > { %v1125_v35 = vpop.f32.mrb[34].mxu1 }
 0x1a0   : > { %v1139_v36 = vadd.f32 %v1135_v28, %v1130_v33  ;;  %v1361_v37 = vpop.f32.mrb[35].mxu1 }
 0x1a2   : > { %v1142_v38 = vmul.f32 %v1139_v36, %v1139_v36 }
 0x1a3   : > { %v1081_v39 = vpop.f32.mrb[32].mxu0 }
 0x1a4   : > { %v1156_v40 = vsel %vm1155_vm11, %v1142_v38, 0.0  ;;  %v1128_v41 = vadd.f32 %v1081_v39, %v1021_v26  ;;  %v1083_v42 = vpop.f32.mrb[33].mxu0 }
 0x1a5   : > { %v1157_v43 = vrot.slane %v1156_v40, 4  ;;  %v1129_v44 = vadd.f32 %v1083_v42, %v1022_v29  ;;  %v1085_v45 = vpop.f32.mrb[34].mxu0 }
 0x1a6   : > { %v1137_v46 = vadd.f32 %v1135_v28, %v1128_v41  ;;  %v1086_v47 = vpop.f32.mrb[35].mxu0 }
 0x1a7   : > { %v1158_v48 = vadd.f32 %v1157_v43, %v1156_v40  ;;  %v1138_v49 = vadd.f32 %v1135_v28, %v1129_v44 }
 0x1a8   : > { %v1140_v50 = vmul.f32 %v1137_v46, %v1137_v46 }
 0x1a9   : > { %v1159_v51 = vrot.slane %v1158_v48, 2  ;;  %v1141_v52 = vmul.f32 %v1138_v49, %v1138_v49 }
 0x1aa   : > { %v1143_v53 = vrot.slane %v1140_v50, 4 }
 0x1ab   : > { %v1160_v54 = vadd.f32 %v1159_v51, %v1158_v48  ;;  %v1149_v55 = vrot.slane %v1141_v52, 4 }
 0x1ac   : > { %v1144_v56 = vadd.f32 %v1143_v53, %v1140_v50 }
 0x1ad   : > { %v1161_v57 = vrot.slane %v1160_v54, 1  ;;  %v1150_v58 = vadd.f32 %v1149_v55, %v1141_v52 }
 0x1ae   : > { %v1145_v59 = vrot.slane %v1144_v56, 2 }
 0x1af   : > { %v1162_v60 = vadd.f32 %v1161_v57, %v1160_v54  ;;  %v1151_v61 = vrot.slane %v1150_v58, 2 }
 0x1b0   : > { %v1146_v62 = vadd.f32 %v1145_v59, %v1144_v56 }
 0x1b1   : > { %v1166_v63 = vmul.f32 0.125, %v1162_v60  ;;  %v1152_v2 = vadd.f32 %v1151_v61, %v1150_v58 }
 0x1b2   : > { %v1147_v3 = vrot.slane %v1146_v62, 1 }
 0x1b3   : > { %v1169_v4 = vadd.f32 1e-08, %v1166_v63  ;;  %v1153_v5 = vrot.slane %v1152_v2, 1 }
 0x1b4   : > { %v1148_v6 = vadd.f32 %v1147_v3, %v1146_v62 }
 0x1b5   : > { %1387 = vrsqrt.f32 %v1169_v4  ;;  %v1154_v7 = vadd.f32 %v1153_v5, %v1152_v2 }
 0x1b6   : > { %v1164_v8 = vmul.f32 0.125, %v1148_v6 }
 0x1b7   : > { %v1165_v9 = vmul.f32 0.125, %v1154_v7 }
 0x1b8   : > { %v1167_v10 = vadd.f32 1e-08, %v1164_v8 }
 0x1b9   : > { %v1168_v11 = vadd.f32 1e-08, %v1165_v9 }
 0x1ba   : > { %1389 = vrsqrt.f32 %v1167_v10 }
 0x1bb   : > { %1391 = vrsqrt.f32 %v1168_v11 }
 0x1bf   : > { %v1388_v12 = vpop.eup %1387 }
 0x1c0   : > { %v1175_v13 = vmul.f32 %v1388_v12, %v1139_v36 }
 0x1c2   : > { %vm1178_vm12 = vcmp.gt.f32.partialorder %v1175_v13, 0.0  ;;  %v1181_v14 = vmul.f32 0.2, %v1175_v13 }
 0x1c4   : > { %v1390_v15 = vpop.eup %1389  ;;  %v1184_v0 = vsel %vm1178_vm12, %v1175_v13, %v1181_v14 }
 0x1c5   : > { %v1392_v16 = vpop.eup %1391  ;;  %1187 = vst.msk [vmem:[%s170_s24 + $0x10] sm:$0xff] %vm1155_vm11, %v1184_v0  ;;  %v1173_v17 = vmul.f32 %v1390_v15, %v1137_v46 }
 0x1c6   : > { %v1174_v18 = vmul.f32 %v1392_v16, %v1138_v49 }
 0x1c7   : > { %vm1176_vm13 = vcmp.gt.f32.partialorder %v1173_v17, 0.0  ;;  %v1179_v19 = vmul.f32 0.2, %v1173_v17 }
 0x1c8   : > { %vm1177_vm14 = vcmp.gt.f32.partialorder %v1174_v18, 0.0  ;;  %v1180_v20 = vmul.f32 0.2, %v1174_v18 }
 0x1c9   : > { %v1182_v21 = vsel %vm1176_vm13, %v1173_v17, %v1179_v19 }
 0x1ca   : > { %1185 = vst [vmem:[%s170_s24] sm:$0xff] %v1182_v21  ;;  %v1183_v22 = vsel %vm1177_vm14, %v1174_v18, %v1180_v20 }
 0x1cb   : > { %1186 = vst [vmem:[%s170_s24 + $0x8] sm:$0xff] %v1183_v22 }
 0x1cc PF: > { %s13_s12 = sadd.s32 1, %s1399_s12  }
 0x1cd   : > { %p10_p4 = scmp.ge.s32.totalorder %s13_s12, 4  }
 0x1cf   :  { %12 = sbr.rel (!%p10_p4) target bundleno = 1 (0x1), region = 70 }

</bundles_post_ra>
